<compile_context>
chip_gen: v7x
topology: tpu7x:2x2x1
jax: 0.10.0
libtpu: 0.0.40
codegen_flags: <defaults>
</compile_context>

<pallas_src>
import numpy as np
import jax
import jax.numpy as jnp
from jax.experimental import pallas as pl
from jax.experimental.pallas import tpu as pltpu

NEG_SLOPE = 0.01   # nn.LeakyReLU default negative_slope
LANE = 128


def _leaky_relu(x):
    # Identical to where(x>0, x, slope*x) for 0 < slope < 1, but 2 VPU ops.
    return jnp.maximum(x, NEG_SLOPE * x)


def _round_up(n, m):
    return ((n + m - 1) // m) * m


# ----------------------------- Pallas kernel ------------------------------- #
def _malware_cnn_kernel(x_ref, w1_ref, b1_ref, w2_ref, b2_ref,
                        wfc1_ref, bfc1_ref, wfc2_ref, bfc2_ref, out_ref):
    P1 = w1_ref.shape[1] // 2          # static: 128-aligned even/odd midpoint
    P2 = w2_ref.shape[1] // 2

    # conv1 (+LeakyReLU) + MaxPool2d((2,1)): one fused [even|odd] banded matmul,
    # split at the 128-aligned midpoint, pairwise max.  p1 lane = pos*32 + chan.
    x = x_ref[...].astype(jnp.bfloat16)
    z1 = jnp.dot(x, w1_ref[...], preferred_element_type=jnp.float32) + b1_ref[...]
    z1 = _leaky_relu(z1)
    p1 = jnp.maximum(z1[:, :P1], z1[:, P1:]).astype(jnp.bfloat16)   # (TB, P1)

    # conv2 (+LeakyReLU) + MaxPool2d((2,1)): same trick.  p2 lane = pos*64 + chan.
    z2 = jnp.dot(p1, w2_ref[...], preferred_element_type=jnp.float32) + b2_ref[...]
    z2 = _leaky_relu(z2)
    p2 = jnp.maximum(z2[:, :P2], z2[:, P2:]).astype(jnp.bfloat16)   # (TB, P2)

    # fc1 + ReLU (wfc1 pre-permuted so torch's channel-major flatten matches
    # p2's position-major lane layout; output padded to 128 lanes).
    h1 = jnp.maximum(
        jnp.dot(p2, wfc1_ref[...], preferred_element_type=jnp.float32)
        + bfc1_ref[...], 0.0).astype(jnp.bfloat16)                  # (TB, 128)
    # TODO(synk): nn.Dropout(p=0.3) is identity at inference; training-mode
    # masking would use pltpu.prng_seed / pltpu.prng_random_bits.

    # fc2 (output padded to 128 lanes for lane-dense stores; sliced in wrapper).
    out_ref[...] = (jnp.dot(h1, wfc2_ref[...], preferred_element_type=jnp.float32)
                    + bfc2_ref[...])


# ------------------------ wrapper: weight re-layout ------------------------- #
def _conv1_fused(conv1_w, conv1_b, H, P1):
    """conv1 [32,1,3,1] -> fused [even|odd] banded matrix [H, 2*P1], bias [1, 2*P1]."""
    w = np.asarray(conv1_w, np.float32)[:, 0, :, 0]      # [C1, K]
    C1, K = w.shape
    H1 = H - K + 1
    H1p = H1 // 2
    W = np.zeros((H, 2 * P1), np.float32)
    b = np.zeros((1, 2 * P1), np.float32)
    for i in range(H1p):
        for k in range(K):
            W[2 * i + k,     i * C1:(i + 1) * C1] = w[:, k]                 # even half
            W[2 * i + 1 + k, P1 + i * C1:P1 + (i + 1) * C1] = w[:, k]       # odd half
    brep = np.tile(np.asarray(conv1_b, np.float32), H1p)
    b[0, :H1p * C1] = brep
    b[0, P1:P1 + H1p * C1] = brep
    return W, b


def _conv2_fused(conv2_w, conv2_b, H1p, P1, P2):
    """conv2 [64,32,3,1] -> fused [even|odd] banded matrix [P1, 2*P2], bias [1, 2*P2]."""
    w = np.asarray(conv2_w, np.float32)[:, :, :, 0]      # [C2, C1, K]
    C2, C1, K = w.shape
    H2 = H1p - K + 1
    H2p = H2 // 2
    W = np.zeros((P1, 2 * P2), np.float32)
    b = np.zeros((1, 2 * P2), np.float32)
    for m in range(H2p):
        for k in range(K):
            W[(2 * m + k) * C1:(2 * m + k + 1) * C1,
              m * C2:(m + 1) * C2] = w[:, :, k].T                            # even half
            W[(2 * m + 1 + k) * C1:(2 * m + 2 + k) * C1,
              P2 + m * C2:P2 + (m + 1) * C2] = w[:, :, k].T                  # odd half
    brep = np.tile(np.asarray(conv2_b, np.float32), H2p)
    b[0, :H2p * C2] = brep
    b[0, P2:P2 + H2p * C2] = brep
    return W, b
    # TODO(synk): banded We/Wo FLOPs/VMEM scale O(H^2); for H >> 128 switch
    # conv2 to 3 tap-shifted matmuls using pltpu.roll instead.


def malware_cnn_forward(x_nchw, params):
    """x_nchw: [B, 1, H, 1] float32 (same NCHW convention as the PyTorch module)."""
    B, _, H, _ = x_nchw.shape
    C1 = params["conv1_w"].shape[0]                      # 32
    C2 = params["conv2_w"].shape[0]                      # 64
    F1h = params["fc1_w"].shape[0]                       # 64
    NC = params["fc2_w"].shape[0]
    H1 = H - 2
    H1p = H1 // 2
    H2 = H1p - 2
    H2p = H2 // 2
    P1 = _round_up(H1p * C1, LANE)                       # 480 -> 512 at H=32
    P2 = _round_up(H2p * C2, LANE)                       # 384 at H=32
    F1p = _round_up(F1h, LANE)                           # 64 -> 128
    NC_pad = _round_up(NC, LANE)

    # --- parameter re-layout (glue only; all compute stays in the kernel) ---
    w1_np, b1_np = _conv1_fused(params["conv1_w"], params["conv1_b"], H, P1)
    w2_np, b2_np = _conv2_fused(params["conv2_w"], params["conv2_b"], H1p, P1, P2)
    # fc1: torch flat index = c*H2p + h  ->  kernel lane index = h*C2 + c
    fc1w = np.asarray(params["fc1_w"], np.float32)       # [F1h, C2*H2p]
    wfc1_np = np.zeros((P2, F1p), np.float32)
    wfc1_np[:H2p * C2, :F1h] = (
        fc1w.reshape(F1h, C2, H2p).transpose(2, 1, 0).reshape(H2p * C2, F1h))
    bfc1_np = np.zeros((1, F1p), np.float32)
    bfc1_np[0, :F1h] = np.asarray(params["fc1_b"], np.float32)
    wfc2_np = np.zeros((F1p, NC_pad), np.float32)
    wfc2_np[:F1h, :NC] = np.asarray(params["fc2_w"], np.float32).T
    bfc2_np = np.zeros((1, NC_pad), np.float32)
    bfc2_np[0, :NC] = np.asarray(params["fc2_b"], np.float32)

    # Matmul operands in bf16 (MXU-native); biases stay f32 for the VPU epilogue.
    w1 = jnp.asarray(w1_np, jnp.bfloat16)
    w2 = jnp.asarray(w2_np, jnp.bfloat16)
    wfc1 = jnp.asarray(wfc1_np, jnp.bfloat16)
    wfc2 = jnp.asarray(wfc2_np, jnp.bfloat16)
    b1 = jnp.asarray(b1_np)
    b2 = jnp.asarray(b2_np)
    bfc1 = jnp.asarray(bfc1_np)
    bfc2 = jnp.asarray(bfc2_np)

    # --- batch tiling: bound tail padding to <= one 8-row sublane group and
    # give the grid >= 2 steps for non-trivial batches (v7x dual-TC sharding).
    TB_CAP = 1024                                        # bf16-safe under v7x's 64 MiB VMEM
    n_steps = max(1, -(-B // TB_CAP))
    if n_steps == 1 and B > 8:
        n_steps = 2
    TB = _round_up(-(-B // n_steps), 8)
    B_pad = TB * n_steps

    x2d = x_nchw[:, 0, :, 0]                             # [B, H]
    if B_pad != B:
        x2d = jnp.pad(x2d, ((0, B_pad - B), (0, 0)))

    weights = [w1, b1, w2, b2, wfc1, bfc1, wfc2, bfc2]
    # Constant index_map => weights are resident; one buffer is enough.
    weight_specs = [
        pl.BlockSpec(w.shape, lambda b: (0, 0), pipeline_mode=pl.Buffered(1))
        for w in weights]

    # VMEM budget: resident weights + per-row f32 intermediates + bf16 dot
    # operands + double-buffered x/out blocks, with 2x headroom, clamped to a
    # limit that is safe on all generations (v7x physical VMEM is 64 MiB).
    weight_bytes = sum(int(np.prod(w.shape)) * w.dtype.itemsize for w in weights)
    act_row = 4 * (2 * P1 + P1 + 2 * P2 + P2 + F1p + NC_pad) + 2 * (H + P1 + P2 + F1p)
    io_row = 2 * 4 * (H + NC_pad)
    vmem_limit = int(min(48 << 20,
                         max(32 << 20, 2 * (weight_bytes + TB * (act_row + io_row)))))

    flops = 2 * B_pad * (H * 2 * P1 + P1 * 2 * P2 + P2 * F1p + F1p * NC_pad)
    bytes_accessed = B_pad * H * 4 + B_pad * NC_pad * 4 + weight_bytes

    out = pl.pallas_call(
        _malware_cnn_kernel,
        out_shape=jax.ShapeDtypeStruct((B_pad, NC_pad), jnp.float32),
        grid_spec=pltpu.PrefetchScalarGridSpec(
            num_scalar_prefetch=0,
            grid=(n_steps,),
            in_specs=[pl.BlockSpec((TB, H), lambda b: (b, 0))] + weight_specs,
            out_specs=pl.BlockSpec((TB, NC_pad), lambda b: (b, 0)),
        ),
        compiler_params=pltpu.CompilerParams(
            dimension_semantics=("parallel",),
            vmem_limit_bytes=vmem_limit),
        cost_estimate=pl.CostEstimate(
            flops=int(flops), transcendentals=0, bytes_accessed=int(bytes_accessed)),
    )(x2d, *weights)
    return out[:B, :NC]                                  # [B, NC]


# ----------------------- deterministic parameter init ----------------------- #
def init_params(key, H, num_classes):
    H1 = H - 2
    H1p = H1 // 2
    H2 = H1p - 2
    H2p = H2 // 2
    flatten = 64 * H2p  # == self.flatten_size in the PyTorch module
    ks = jax.random.split(key, 8)

    def u(k, shape, fan_in):  # torch-like uniform(-1/sqrt(fan_in), 1/sqrt(fan_in))
        bound = 1.0 / np.sqrt(fan_in)
        return jax.random.uniform(k, shape, jnp.float32, -bound, bound)

    return {
        "conv1_w": u(ks[0], (32, 1, 3, 1), 3),
        "conv1_b": u(ks[1], (32,), 3),
        "conv2_w": u(ks[2], (64, 32, 3, 1), 32 * 3),
        "conv2_b": u(ks[3], (64,), 32 * 3),
        "fc1_w":   u(ks[4], (64, flatten), flatten),
        "fc1_b":   u(ks[5], (64,), flatten),
        "fc2_w":   u(ks[6], (num_classes, 64), 64),
        "fc2_b":   u(ks[7], (num_classes,), 64),
    }


# --------------------------- pure-JAX reference ----------------------------- #
def reference_forward(x_nchw, params):
    """Plain-JAX (f32) mirror of the PyTorch forward (eval mode)."""
    B = x_nchw.shape[0]
    x = x_nchw[:, 0, :, 0]                               # [B, H]
    H = x.shape[1]
    H1 = H - 2
    w1 = params["conv1_w"][:, 0, :, 0]                   # [32, 3]
    y1 = jnp.stack([x[:, k:k + H1] for k in range(3)], axis=-1) @ w1.T + params["conv1_b"]
    y1 = jnp.where(y1 > 0, y1, NEG_SLOPE * y1)
    H1p = H1 // 2
    y1 = jnp.max(y1[:, :2 * H1p, :].reshape(B, H1p, 2, 32), axis=2)
    H2 = H1p - 2
    patches = jnp.concatenate([y1[:, k:k + H2, :] for k in range(3)], axis=-1)
    w2 = jnp.transpose(params["conv2_w"][:, :, :, 0], (2, 1, 0)).reshape(3 * 32, 64)
    y2 = patches @ w2 + params["conv2_b"]
    y2 = jnp.where(y2 > 0, y2, NEG_SLOPE * y2)
    H2p = H2 // 2
    y2 = jnp.max(y2[:, :2 * H2p, :].reshape(B, H2p, 2, 64), axis=2)     # [B, H2p, 64]
    flat = jnp.transpose(y2, (0, 2, 1)).reshape(B, 64 * H2p)            # torch .view order
    h = jnp.maximum(flat @ params["fc1_w"].T + params["fc1_b"], 0.0)
    return h @ params["fc2_w"].T + params["fc2_b"]


if __name__ == "__main__":
    B, H, NUM_CLASSES = 2, 32, 10   # H = number of tabular features; NCHW input [B,1,H,1]
    key = jax.random.PRNGKey(0)
    kx, kp = jax.random.split(key)
    x = jax.random.normal(kx, (B, 1, H, 1), jnp.float32)
    params = init_params(kp, H, NUM_CLASSES)

    out = jax.block_until_ready(malware_cnn_forward(x, params))
    ref = jax.block_until_ready(reference_forward(x, params))
    # bf16 matmul operands with f32 accumulation -> ~1e-2-level tolerance.
    np.testing.assert_allclose(np.asarray(out), np.asarray(ref), rtol=3e-2, atol=3e-2)
    print("KERNEL_OK")
</pallas_src>

<mosaic_0001>
module attributes {stable_mosaic.version = 11 : i64} {
  func.func @_malware_cnn_kernel(%arg0: i32, %arg1: memref<8x32xf32, #tpu.memory_space<vmem>>, %arg2: memref<32x1024xbf16, #tpu.memory_space<vmem>>, %arg3: memref<1x1024xf32, #tpu.memory_space<vmem>>, %arg4: memref<512x768xbf16, #tpu.memory_space<vmem>>, %arg5: memref<1x768xf32, #tpu.memory_space<vmem>>, %arg6: memref<384x128xbf16, #tpu.memory_space<vmem>>, %arg7: memref<1x128xf32, #tpu.memory_space<vmem>>, %arg8: memref<128x128xbf16, #tpu.memory_space<vmem>>, %arg9: memref<1x128xf32, #tpu.memory_space<vmem>>, %arg10: memref<8x128xf32, #tpu.memory_space<vmem>>) attributes {dimension_semantics = [#tpu.dimension_semantics<parallel>], iteration_bounds = array<i64: 1>, scalar_prefetch = 0 : i64, scratch_operands = 0 : i64, tpu.core_type = #tpu.core_type<tc>, window_params = [{transform_indices = @transform_0, window_bounds = array<i64: 8, 32>}, {pipeline_mode = #tpu.pipeline_mode<synchronous>, transform_indices = @transform_1, window_bounds = array<i64: 32, 1024>}, {pipeline_mode = #tpu.pipeline_mode<synchronous>, transform_indices = @transform_2, window_bounds = array<i64: 1, 1024>}, {pipeline_mode = #tpu.pipeline_mode<synchronous>, transform_indices = @transform_3, window_bounds = array<i64: 512, 768>}, {pipeline_mode = #tpu.pipeline_mode<synchronous>, transform_indices = @transform_4, window_bounds = array<i64: 1, 768>}, {pipeline_mode = #tpu.pipeline_mode<synchronous>, transform_indices = @transform_5, window_bounds = array<i64: 384, 128>}, {pipeline_mode = #tpu.pipeline_mode<synchronous>, transform_indices = @transform_6, window_bounds = array<i64: 1, 128>}, {pipeline_mode = #tpu.pipeline_mode<synchronous>, transform_indices = @transform_7, window_bounds = array<i64: 128, 128>}, {pipeline_mode = #tpu.pipeline_mode<synchronous>, transform_indices = @transform_8, window_bounds = array<i64: 1, 128>}, {transform_indices = @transform_9, window_bounds = array<i64: 8, 128>}]} {
    %c0 = arith.constant 0 : index
    %c0_0 = arith.constant 0 : index
    %0 = vector.load %arg1[%c0, %c0_0] : memref<8x32xf32, #tpu.memory_space<vmem>>, vector<8x32xf32>
    %1 = arith.truncf %0 : vector<8x32xf32> to vector<8x32xbf16>
    %c0_1 = arith.constant 0 : index
    %c0_2 = arith.constant 0 : index
    %2 = vector.load %arg2[%c0_1, %c0_2] : memref<32x1024xbf16, #tpu.memory_space<vmem>>, vector<32x1024xbf16>
    %cst = arith.constant dense<0.000000e+00> : vector<8x1024xf32>
    %3 = tpu.matmul %1, %2, %cst {dimension_numbers = #tpu.dot_dimension_numbers<[1], [0], [0], [1], [0, 0, 1, 1], [], []>} : vector<8x32xbf16>, vector<32x1024xbf16>, vector<8x1024xf32> -> vector<8x1024xf32>
    %c0_3 = arith.constant 0 : index
    %c0_4 = arith.constant 0 : index
    %4 = vector.load %arg3[%c0_3, %c0_4] : memref<1x1024xf32, #tpu.memory_space<vmem>>, vector<1x1024xf32>
    %5 = vector.broadcast %4 : vector<1x1024xf32> to vector<8x1024xf32>
    %6 = arith.addf %3, %5 : vector<8x1024xf32>
    %cst_5 = arith.constant 0.00999999977 : f32
    %7 = vector.broadcast %cst_5 : f32 to vector<8x1024xf32>
    %8 = arith.mulf %7, %6 : vector<8x1024xf32>
    %9 = arith.maximumf %6, %8 : vector<8x1024xf32>
    %10 = vector.extract_strided_slice %9 {offsets = [0, 0], sizes = [8, 512], strides = [1, 1]} : vector<8x1024xf32> to vector<8x512xf32>
    %11 = vector.extract_strided_slice %9 {offsets = [0, 512], sizes = [8, 512], strides = [1, 1]} : vector<8x1024xf32> to vector<8x512xf32>
    %12 = arith.maximumf %10, %11 : vector<8x512xf32>
    %13 = arith.truncf %12 : vector<8x512xf32> to vector<8x512xbf16>
    %c0_6 = arith.constant 0 : index
    %c0_7 = arith.constant 0 : index
    %14 = vector.load %arg4[%c0_6, %c0_7] : memref<512x768xbf16, #tpu.memory_space<vmem>>, vector<512x768xbf16>
    %cst_8 = arith.constant dense<0.000000e+00> : vector<8x768xf32>
    %15 = tpu.matmul %13, %14, %cst_8 {dimension_numbers = #tpu.dot_dimension_numbers<[1], [0], [0], [1], [0, 0, 1, 1], [], []>} : vector<8x512xbf16>, vector<512x768xbf16>, vector<8x768xf32> -> vector<8x768xf32>
    %c0_9 = arith.constant 0 : index
    %c0_10 = arith.constant 0 : index
    %16 = vector.load %arg5[%c0_9, %c0_10] : memref<1x768xf32, #tpu.memory_space<vmem>>, vector<1x768xf32>
    %17 = vector.broadcast %16 : vector<1x768xf32> to vector<8x768xf32>
    %18 = arith.addf %15, %17 : vector<8x768xf32>
    %cst_11 = arith.constant 0.00999999977 : f32
    %19 = vector.broadcast %cst_11 : f32 to vector<8x768xf32>
    %20 = arith.mulf %19, %18 : vector<8x768xf32>
    %21 = arith.maximumf %18, %20 : vector<8x768xf32>
    %22 = vector.extract_strided_slice %21 {offsets = [0, 0], sizes = [8, 384], strides = [1, 1]} : vector<8x768xf32> to vector<8x384xf32>
    %23 = vector.extract_strided_slice %21 {offsets = [0, 384], sizes = [8, 384], strides = [1, 1]} : vector<8x768xf32> to vector<8x384xf32>
    %24 = arith.maximumf %22, %23 : vector<8x384xf32>
    %25 = arith.truncf %24 : vector<8x384xf32> to vector<8x384xbf16>
    %c0_12 = arith.constant 0 : index
    %c0_13 = arith.constant 0 : index
    %26 = vector.load %arg6[%c0_12, %c0_13] : memref<384x128xbf16, #tpu.memory_space<vmem>>, vector<384x128xbf16>
    %cst_14 = arith.constant dense<0.000000e+00> : vector<8x128xf32>
    %27 = tpu.matmul %25, %26, %cst_14 {dimension_numbers = #tpu.dot_dimension_numbers<[1], [0], [0], [1], [0, 0, 1, 1], [], []>} : vector<8x384xbf16>, vector<384x128xbf16>, vector<8x128xf32> -> vector<8x128xf32>
    %c0_15 = arith.constant 0 : index
    %c0_16 = arith.constant 0 : index
    %28 = vector.load %arg7[%c0_15, %c0_16] : memref<1x128xf32, #tpu.memory_space<vmem>>, vector<1x128xf32>
    %29 = vector.broadcast %28 : vector<1x128xf32> to vector<8x128xf32>
    %30 = arith.addf %27, %29 : vector<8x128xf32>
    %cst_17 = arith.constant 0.000000e+00 : f32
    %31 = vector.broadcast %cst_17 : f32 to vector<8x128xf32>
    %32 = arith.maximumf %30, %31 : vector<8x128xf32>
    %33 = arith.truncf %32 : vector<8x128xf32> to vector<8x128xbf16>
    %c0_18 = arith.constant 0 : index
    %c0_19 = arith.constant 0 : index
    %34 = vector.load %arg8[%c0_18, %c0_19] : memref<128x128xbf16, #tpu.memory_space<vmem>>, vector<128x128xbf16>
    %cst_20 = arith.constant dense<0.000000e+00> : vector<8x128xf32>
    %35 = tpu.matmul %33, %34, %cst_20 {dimension_numbers = #tpu.dot_dimension_numbers<[1], [0], [0], [1], [0, 0, 1, 1], [], []>} : vector<8x128xbf16>, vector<128x128xbf16>, vector<8x128xf32> -> vector<8x128xf32>
    %c0_21 = arith.constant 0 : index
    %c0_22 = arith.constant 0 : index
    %36 = vector.load %arg9[%c0_21, %c0_22] : memref<1x128xf32, #tpu.memory_space<vmem>>, vector<1x128xf32>
    %37 = vector.broadcast %36 : vector<1x128xf32> to vector<8x128xf32>
    %38 = arith.addf %35, %37 : vector<8x128xf32>
    %c0_23 = arith.constant 0 : index
    %c0_24 = arith.constant 0 : index
    %39 = vector.load %arg10[%c0_23, %c0_24] : memref<8x128xf32, #tpu.memory_space<vmem>>, vector<8x128xf32>
    tpu.vector_store %arg10[%c0_23, %c0_24], %38 {strides = array<i32>} : memref<8x128xf32, #tpu.memory_space<vmem>>, vector<8x128xf32>,
    return
  }
  func.func @transform_0(%arg0: i32) -> (i32, i32) {
    %c0_i32 = arith.constant 0 : i32
    %c0_i32_0 = arith.constant 0 : i32
    return %arg0, %c0_i32 : i32, i32
  }
  func.func @transform_1(%arg0: i32) -> (i32, i32) {
    %c0_i32 = arith.constant 0 : i32
    %c0_i32_0 = arith.constant 0 : i32
    %c0_i32_1 = arith.constant 0 : i32
    return %c0_i32, %c0_i32_0 : i32, i32
  }
  func.func @transform_2(%arg0: i32) -> (i32, i32) {
    %c0_i32 = arith.constant 0 : i32
    %c0_i32_0 = arith.constant 0 : i32
    %c0_i32_1 = arith.constant 0 : i32
    return %c0_i32, %c0_i32_0 : i32, i32
  }
  func.func @transform_3(%arg0: i32) -> (i32, i32) {
    %c0_i32 = arith.constant 0 : i32
    %c0_i32_0 = arith.constant 0 : i32
    %c0_i32_1 = arith.constant 0 : i32
    return %c0_i32, %c0_i32_0 : i32, i32
  }
  func.func @transform_4(%arg0: i32) -> (i32, i32) {
    %c0_i32 = arith.constant 0 : i32
    %c0_i32_0 = arith.constant 0 : i32
    %c0_i32_1 = arith.constant 0 : i32
    return %c0_i32, %c0_i32_0 : i32, i32
  }
  func.func @transform_5(%arg0: i32) -> (i32, i32) {
    %c0_i32 = arith.constant 0 : i32
    %c0_i32_0 = arith.constant 0 : i32
    %c0_i32_1 = arith.constant 0 : i32
    return %c0_i32, %c0_i32_0 : i32, i32
  }
  func.func @transform_6(%arg0: i32) -> (i32, i32) {
    %c0_i32 = arith.constant 0 : i32
    %c0_i32_0 = arith.constant 0 : i32
    %c0_i32_1 = arith.constant 0 : i32
    return %c0_i32, %c0_i32_0 : i32, i32
  }
  func.func @transform_7(%arg0: i32) -> (i32, i32) {
    %c0_i32 = arith.constant 0 : i32
    %c0_i32_0 = arith.constant 0 : i32
    %c0_i32_1 = arith.constant 0 : i32
    return %c0_i32, %c0_i32_0 : i32, i32
  }
  func.func @transform_8(%arg0: i32) -> (i32, i32) {
    %c0_i32 = arith.constant 0 : i32
    %c0_i32_0 = arith.constant 0 : i32
    %c0_i32_1 = arith.constant 0 : i32
    return %c0_i32, %c0_i32_0 : i32, i32
  }
  func.func @transform_9(%arg0: i32) -> (i32, i32) {
    %c0_i32 = arith.constant 0 : i32
    %c0_i32_0 = arith.constant 0 : i32
    return %arg0, %c0_i32 : i32, i32
  }
}

</mosaic_0001>

<bundles_post_ra>
// kernel: tpu_custom_call.1
= control target key start
LH: loop header
LB: loop body
LE: loop exit
PB: predicated region body
PF: predicated region fallthrough
CT: control target
= control target key end

     0   :  { %14 = vsyncpa [#allocation3], 0  ;;  %s3398_s0 = inlined_call_operand.hbm [shape: f32[8,32], index: 0, kind: input, shape index: {}]   ;;  %s3399_s1 = inlined_call_operand.hbm [shape: bf16[32,1024], index: 1, kind: input, shape index: {}]   ;;  %s3400_s2 = inlined_call_operand.hbm [shape: f32[1,1024], index: 2, kind: input, shape index: {}]   ;;  %s3401_s3 = inlined_call_operand.hbm [shape: bf16[512,768], index: 3, kind: input, shape index: {}]   ;;  %s3402_s4 = inlined_call_operand.vmem [shape: f32[1,768], index: 4, kind: input, shape index: {}]   ;;  %s3403_s5 = inlined_call_operand.hbm [shape: bf16[384,128], index: 5, kind: input, shape index: {}]   ;;  %s3404_s6 = inlined_call_operand.vmem [shape: f32[1,128], index: 6, kind: input, shape index: {}]   ;;  %s3405_s7 = inlined_call_operand.hbm [shape: bf16[128,128], index: 7, kind: input, shape index: {}]   ;;  %s3406_s8 = inlined_call_operand.vmem [shape: f32[1,128], index: 8, kind: input, shape index: {}]   ;;  %s3407_s9 = inlined_call_operand.hbm [shape: f32[8,128], index: 9, kind: output, shape index: {}]  }
   0x1   :  { %15 = vsyncpa [#allocation6], 0 }
   0x2   :  { %16 = vsyncpa [#allocation9], 0 }
   0x3   :  { %17 = vsyncpa [#allocation12], 0 }
   0x4   :  { %18 = vsyncpa [#allocation4], 0  ;;  %s3147_s30 = smov [#allocation5]   ;;  %s2983_s13 = scalar_lea.hbm %s3399_s1, 2048 }
   0x5   :  { %s34_s10 = sshll.u32 %s3147_s30, 4  ;;  %p2984_p0 = scmp.ne.s32.totalorder %s3399_s1, %s2983_s13  ;;  %s35_s10 = int_to_ptr.vmem [resolvable:$true] %s34_s10 }
   0x6   :  { %p2987_p1 = scmp.lt.u32.totalorder %s2983_s13, %s3399_s1 }
   0x8   :  { %p2989_p2 = pnand %p2987_p1, %p2984_p0 }
   0xa   :  { %2992 = shalt.err (!%p2989_p2)
}
   0xb   :  { %s2993_s18 = scalar_lea.vmem %s35_s10, 2048  ;;  %p2998_p4 = scmp.lt.s32.totalorder %s35_s10, %s35_s10 }
   0xc   :  { %p2994_p3 = scmp.ne.s32.totalorder %s35_s10, %s2993_s18  ;;  %p2999_p5 = scmp.lt.s32.totalorder %s2993_s18, %s2993_s18 }
   0xe   :  { %p3000_p6 = por %p2999_p5, %p2998_p4 }
  0x10   :  { %p3001_p7 = pnand %p3000_p6, %p2994_p3 }
  0x12   :  { %3004 = shalt.err (!%p3001_p7)
}
  0x13   :  { %s3148_s19 = smov 512   ;;  %s3149_s20 = smov 32  }
  0x14   :  { %40 = dma.hbm_to_vmem [thread:$0]  %s3399_s1, 2048, %s35_s10, [#allocation6], %s3148_s19, %s3148_s19, %s3149_s20  }
  0x15   :  { %s3150_s23 = smov [#allocation8]   ;;  %s3005_s27 = scalar_lea.hbm %s3401_s3, 24576 }
  0x16   :  { %s56_s24 = sshll.u32 %s3150_s23, 4  ;;  %p3006_p8 = scmp.ne.s32.totalorder %s3401_s3, %s3005_s27  ;;  %s57_s24 = int_to_ptr.vmem [resolvable:$true] %s56_s24 }
  0x17   :  { %p3009_p9 = scmp.lt.u32.totalorder %s3005_s27, %s3401_s3 }
  0x19   :  { %p3011_p10 = pnand %p3009_p9, %p3006_p8 }
  0x1b   :  { %3014 = shalt.err (!%p3011_p10)
}
  0x1c   :  { %s3015_s12 = scalar_lea.vmem %s57_s24, 24576  ;;  %p3020_p12 = scmp.lt.s32.totalorder %s57_s24, %s57_s24 }
  0x1d   :  { %p3016_p11 = scmp.ne.s32.totalorder %s57_s24, %s3015_s12  ;;  %p3021_p13 = scmp.lt.s32.totalorder %s3015_s12, %s3015_s12 }
  0x1f   :  { %p3022_p0 = por %p3021_p13, %p3020_p12 }
  0x21   :  { %p3023_p1 = pnand %p3022_p0, %p3016_p11 }
  0x23   :  { %3026 = shalt.err (!%p3023_p1)
}
  0x24   :  { %s3151_s1 = smov 384   ;;  %s3152_s10 = smov 24  }
  0x25   :  { %62 = dma.hbm_to_vmem [thread:$0]  %s3401_s3, 24576, %s57_s24, [#allocation9], %s3151_s1, %s3151_s1, %s3152_s10  }
  0x26   :  { %s3153_s15 = smov [#allocation2]   ;;  %s3154_s17 = smov [#allocation7]  }
  0x27   :  { %s25_s16 = sshll.u32 %s3153_s15, 4  ;;  %s47_s18 = sshll.u32 %s3154_s17, 4  ;;  %s26_s16 = int_to_ptr.vmem [resolvable:$true] %s25_s16  ;;  %s48_s18 = int_to_ptr.vmem [resolvable:$true] %s47_s18 }
  0x28   :  { %s3027_s21 = scalar_lea.hbm %s3398_s0, 128 }
  0x29   :  { %p3028_p2 = scmp.ne.s32.totalorder %s3398_s0, %s3027_s21  ;;  %p3031_p3 = scmp.lt.u32.totalorder %s3027_s21, %s3398_s0 }
  0x2b   :  { %p3033_p4 = pnand %p3031_p3, %p3028_p2 }
  0x2d   :  { %3036 = shalt.err (!%p3033_p4)
}
  0x2e   :  { %s3037_s3 = scalar_lea.vmem %s26_s16, 128  ;;  %p3042_p6 = scmp.lt.s32.totalorder %s26_s16, %s26_s16 }
  0x2f   :  { %p3038_p5 = scmp.ne.s32.totalorder %s26_s16, %s3037_s3  ;;  %p3043_p7 = scmp.lt.s32.totalorder %s3037_s3, %s3037_s3 }
  0x31   :  { %p3044_p8 = por %p3043_p7, %p3042_p6 }
  0x33   :  { %p3045_p9 = pnand %p3044_p8, %p3038_p5 }
  0x35   :  { %3048 = shalt.err (!%p3045_p9)
}
  0x36   :  { %28 = dma.hbm_to_vmem [thread:$0]  %s3398_s0, 128, %s26_s16, [#allocation3]  }
  0x37   :  { %s3049_s30 = scalar_lea.hbm %s3400_s2, 128 }
  0x38   :  { %p3050_p10 = scmp.ne.s32.totalorder %s3400_s2, %s3049_s30  ;;  %p3053_p11 = scmp.lt.u32.totalorder %s3049_s30, %s3400_s2 }
  0x3a   :  { %p3055_p12 = pnand %p3053_p11, %p3050_p10 }
  0x3c   :  { %3058 = shalt.err (!%p3055_p12)
}
  0x3d   :  { %s3059_s13 = scalar_lea.vmem %s48_s18, 128  ;;  %p3064_p0 = scmp.lt.s32.totalorder %s48_s18, %s48_s18 }
  0x3e   :  { %p3060_p13 = scmp.ne.s32.totalorder %s48_s18, %s3059_s13  ;;  %p3065_p1 = scmp.lt.s32.totalorder %s3059_s13, %s3059_s13 }
  0x40   :  { %p3066_p2 = por %p3065_p1, %p3064_p0 }
  0x42   :  { %p3067_p3 = pnand %p3066_p2, %p3060_p13 }
  0x44   :  { %3070 = shalt.err (!%p3067_p3)
}
  0x45   :  { %50 = dma.hbm_to_vmem [thread:$0]  %s3400_s2, 128, %s48_s18, [#allocation6]  }
  0x46   :  { %s3155_s15 = smov [#allocation10]   ;;  %s3071_s20 = scalar_lea.hbm %s3403_s5, 3072 }
  0x47   :  { %s70_s16 = sshll.u32 %s3155_s15, 4  ;;  %p3072_p4 = scmp.ne.s32.totalorder %s3403_s5, %s3071_s20  ;;  %s71_s16 = int_to_ptr.vmem [resolvable:$true] %s70_s16 }
  0x48   :  { %p3075_p5 = scmp.lt.u32.totalorder %s3071_s20, %s3403_s5 }
  0x4a   :  { %p3077_p6 = pnand %p3075_p5, %p3072_p4 }
  0x4c   :  { %3080 = shalt.err (!%p3077_p6)
}
  0x4d   :  { %s3081_s26 = scalar_lea.vmem %s71_s16, 3072  ;;  %p3086_p8 = scmp.lt.s32.totalorder %s71_s16, %s71_s16 }
  0x4e   :  { %p3082_p7 = scmp.ne.s32.totalorder %s71_s16, %s3081_s26  ;;  %p3087_p9 = scmp.lt.s32.totalorder %s3081_s26, %s3081_s26 }
  0x50   :  { %p3088_p10 = por %p3087_p9, %p3086_p8 }
  0x52   :  { %p3089_p11 = pnand %p3088_p10, %p3082_p7 }
  0x54   :  { %3092 = shalt.err (!%p3089_p11)
}
  0x55   :  { %s3156_s2 = smov 64   ;;  %s3157_s18 = smov 4  }
  0x56   :  { %76 = dma.hbm_to_vmem [thread:$0]  %s3403_s5, 3072, %s71_s16, [#allocation9], %s3156_s2, %s3156_s2, %s3157_s18  }
  0x57   :  { %s3158_s27 = smov [#allocation11]   ;;  %s3093_s11 = scalar_lea.hbm %s3405_s7, 1024 }
  0x58   :  { %s84_s28 = sshll.u32 %s3158_s27, 4  ;;  %p3094_p12 = scmp.ne.s32.totalorder %s3405_s7, %s3093_s11  ;;  %s85_s28 = int_to_ptr.vmem [resolvable:$true] %s84_s28 }
  0x59   :  { %p3097_p13 = scmp.lt.u32.totalorder %s3093_s11, %s3405_s7 }
  0x5b   :  { %p3099_p0 = pnand %p3097_p13, %p3094_p12 }
  0x5d   :  { %3102 = shalt.err (!%p3099_p0)
}
  0x5e   :  { %s3103_s0 = scalar_lea.vmem %s85_s28, 1024  ;;  %p3108_p2 = scmp.lt.s32.totalorder %s85_s28, %s85_s28 }
  0x5f   :  { %p3104_p1 = scmp.ne.s32.totalorder %s85_s28, %s3103_s0  ;;  %p3109_p3 = scmp.lt.s32.totalorder %s3103_s0, %s3103_s0 }
  0x61   :  { %p3110_p4 = por %p3109_p3, %p3108_p2 }
  0x63   :  { %p3111_p5 = pnand %p3110_p4, %p3104_p1 }
  0x65   :  { %3114 = shalt.err (!%p3111_p5)
}
  0x66   :  { %90 = dma.hbm_to_vmem [thread:$0]  %s3405_s7, 1024, %s85_s28, [#allocation12], %s3156_s2, %s3156_s2, %s3157_s18  }
  0x67   :  { %3137 = dma.done.wait [#allocation3], 128  }
  0x68   :  { %3138 = vsyncadd [#allocation3], 4294967168 }
  0x69   :  { %3139 = dma.done.wait [#allocation6], 2176  }
  0x6a   :  { %3140 = vsyncadd [#allocation6], 4294965120 }
  0x6b   :  { %3141 = dma.done.wait [#allocation9], 27648  }
  0x6c   :  { %3142 = vsyncadd [#allocation9], 4294939648 }
  0x6d   :  { %3143 = dma.done.wait [#allocation12], 1024  }
  0x6e   :  { %3144 = vsyncadd [#allocation12], 4294966272  ;;  %v3159_v0 = vmov 0   ;;  %v114_v1 = vld [vmem:[#allocation5] sm:$0xff]  ;;  %v115_v8 = vld [vmem:[#allocation5 + $0x8] sm:$0xff]  ;;  %vm252_vm0 = vcmask 261120  }
  0x6f   :  { %288 = vmatprep.mubr.bf16.mxu1 %v3159_v0  ;;  %v118_v2 = vld [vmem:[#allocation5 + $0x20] sm:$0xff]  ;;  %v119_v9 = vld [vmem:[#allocation5 + $0x28] sm:$0xff]  ;;  %v112_v11 = vld [vmem:[#allocation2] sm:$0xff]  ;;  %vm3161_vm1 = vmmov 0   ;;  %s3162_s20 = smov [#allocation13]  }
  0x70   :  { %v122_v3 = vld [vmem:[#allocation5 + $0x40] sm:$0xff]  ;;  %v2304_v4 = vcombine.high %v114_v1, %v118_v2  ;;  %v2303_v5 = vcombine.low %v114_v1, %v118_v2  ;;  %v2306_v12 = vcombine.high %v115_v8, %v119_v9  ;;  %v123_v13 = vld [vmem:[#allocation5 + $0x48] sm:$0xff]  ;;  %v3286_v16 = vpack.c.bf16 %v112_v11, %v112_v11  ;;  %v2669_v20 = vld [vmem:[#allocation8 + $0x34] ss:$24 sps:$4 sm:$0xff]   ;;  %s2291_s21 = sshll.u32 %s3162_s20, 4  ;;  %s2292_s21 = int_to_ptr.vmem [resolvable:$true] %s2291_s21 }
  0x71   :  { %v126_v6 = vld [vmem:[#allocation5 + $0x60] sm:$0xff]  ;;  %v127_v14 = vld [vmem:[#allocation5 + $0x68] sm:$0xff]  ;;  %v2305_v17 = vcombine.low %v115_v8, %v119_v9  ;;  %v116_v21 = vld [vmem:[#allocation5 + $0x10] sm:$0xff]  ;;  %p3120_p7 = scmp.lt.s32.totalorder %s2292_s21, %s2292_s21 }
  0x72   :  { %v2312_v7 = vcombine.high %v122_v3, %v126_v6  ;;  %256 = vmatprep.subr.bf16.mxu1 %v2304_v4  ;;  %v2311_v10 = vcombine.low %v122_v3, %v126_v6  ;;  %v2663_v15 = vld [vmem:[#allocation8 + $0x4] ss:$24 sps:$4 sm:$0xff]   ;;  %v2668_v18 = vld [vmem:[#allocation8] ss:$24 sps:$4 sm:$0xff]   ;;  %v2314_v19 = vcombine.high %v123_v13, %v127_v14  ;;  %v120_v22 = vld [vmem:[#allocation5 + $0x30] sm:$0xff]  ;;  %v2313_v25 = vcombine.low %v123_v13, %v127_v14 }
  0x73   :  { %257 = vmatpush1.bf16.msra.mxu1 %v2303_v5  ;;  %1628 = vmatprep.subr.bf16.mxu0 %v2663_v15  ;;  %v2674_v23 = vld [vmem:[#allocation8 + $0x30] ss:$24 sps:$4 sm:$0xff]   ;;  %v2675_v24 = vld [vmem:[#allocation8 + $0x64] ss:$24 sps:$4 sm:$0xff]   ;;  %v2308_v26 = vcombine.high %v116_v21, %v120_v22  ;;  %v2680_v29 = vld [vmem:[#allocation8 + $0x60] ss:$24 sps:$4 sm:$0xff]   ;;  %v2307_v31 = vcombine.low %v116_v21, %v120_v22 }
  0x74   :  { %258 = vmatprep.subr.bf16.mxu1 %v2312_v7  ;;  %1629 = vmatpush1.bf16.msra.mxu0 %v2668_v18  ;;  %v124_v27 = vld [vmem:[#allocation5 + $0x50] sm:$0xff]  ;;  %v117_v33 = vld [vmem:[#allocation5 + $0x18] sm:$0xff]  ;;  %v2687_v36 = vld [vmem:[#allocation8 + $0xc4] ss:$24 sps:$4 sm:$0xff]  }
  0x75   :  { %1630 = vmatprep.subr.bf16.mxu0 %v2669_v20  ;;  %v128_v28 = vld [vmem:[#allocation5 + $0x70] sm:$0xff]  ;;  %v121_v34 = vld [vmem:[#allocation5 + $0x38] sm:$0xff]  ;;  %v2692_v41 = vld [vmem:[#allocation8 + $0xc0] ss:$24 sps:$4 sm:$0xff]  }
  0x76   :  { %v2681_v30 = vld [vmem:[#allocation8 + $0x94] ss:$24 sps:$4 sm:$0xff]   ;;  %v2316_v32 = vcombine.high %v124_v27, %v128_v28  ;;  %v2686_v35 = vld [vmem:[#allocation8 + $0x90] ss:$24 sps:$4 sm:$0xff]   ;;  %v2315_v37 = vcombine.low %v124_v27, %v128_v28  ;;  %v2310_v38 = vcombine.high %v117_v33, %v121_v34  ;;  %v2309_v43 = vcombine.low %v117_v33, %v121_v34  ;;  %v2699_v46 = vld [vmem:[#allocation8 + $0x124] ss:$24 sps:$4 sm:$0xff]  }
  0x77   :  { %259 = vmatpush1.bf16.msra.mxu1 %v2311_v10  ;;  %v125_v39 = vld [vmem:[#allocation5 + $0x58] sm:$0xff]  ;;  %v2667_v48 = vld [vmem:[#allocation8 + $0xc] ss:$24 sps:$4 sm:$0xff]   ;;  %v2704_v49 = vld [vmem:[#allocation8 + $0x120] ss:$24 sps:$4 sm:$0xff]  }
  0x78   :  { %297 = vmatprep.subr.bf16.mxu1 %v2306_v12  ;;  %1631 = vmatpush1.bf16.msra.mxu0 %v2674_v23  ;;  %v129_v40 = vld [vmem:[#allocation5 + $0x78] sm:$0xff]  ;;  %v2665_v51 = vld [vmem:[#allocation8 + $0x8] ss:$24 sps:$4 sm:$0xff]   ;;  %v2711_v54 = vld [vmem:[#allocation8 + $0x184] ss:$24 sps:$4 sm:$0xff]  }
  0x79   :  { %1632 = vmatprep.subr.bf16.mxu0 %v2675_v24  ;;  %v2693_v42 = vld [vmem:[#allocation8 + $0xf4] ss:$24 sps:$4 sm:$0xff]   ;;  %v2318_v44 = vcombine.high %v125_v39, %v129_v40  ;;  %v2698_v45 = vld [vmem:[#allocation8 + $0xf0] ss:$24 sps:$4 sm:$0xff]   ;;  %v2317_v47 = vcombine.low %v125_v39, %v129_v40  ;;  %v2716_v57 = vld [vmem:[#allocation8 + $0x180] ss:$24 sps:$4 sm:$0xff]  }
  0x7a   :  { %2319 = vmatmul.mubr.msk.bf16.vlgmr.msra.gmra.mrb[0].mxu1 %vm252_vm0, %v3286_v16  ;;  %v2705_v50 = vld [vmem:[#allocation8 + $0x154] ss:$24 sps:$4 sm:$0xff]   ;;  %v2710_v53 = vld [vmem:[#allocation8 + $0x150] ss:$24 sps:$4 sm:$0xff]   ;;  %v2723_v11 = vld [vmem:[#allocation8 + $0x1e4] ss:$24 sps:$4 sm:$0xff]  }
  0x7b   :  { %298 = vmatpush1.bf16.msra.mxu1 %v2305_v17  ;;  %329 = vmatprep.mubr.bf16.mxu1 %v3159_v0  ;;  %v2673_v52 = vld [vmem:[#allocation8 + $0x3c] ss:$24 sps:$4 sm:$0xff]   ;;  %v2671_v55 = vld [vmem:[#allocation8 + $0x38] ss:$24 sps:$4 sm:$0xff]   ;;  %v2679_v56 = vld [vmem:[#allocation8 + $0x6c] ss:$24 sps:$4 sm:$0xff]  }
  0x7c   :  { %299 = vmatprep.subr.bf16.mxu1 %v2314_v19  ;;  %1633 = vmatpush1.bf16.msra.mxu0 %v2680_v29  ;;  %v2677_v58 = vld [vmem:[#allocation8 + $0x68] ss:$24 sps:$4 sm:$0xff]   ;;  %v2685_v59 = vld [vmem:[#allocation8 + $0x9c] ss:$24 sps:$4 sm:$0xff]   ;;  %v2683_v60 = vld [vmem:[#allocation8 + $0x98] ss:$24 sps:$4 sm:$0xff]  }
  0x7d   :  { %1634 = vmatprep.subr.bf16.mxu0 %v2681_v30  ;;  %v2691_v61 = vld [vmem:[#allocation8 + $0xcc] ss:$24 sps:$4 sm:$0xff]   ;;  %v2689_v62 = vld [vmem:[#allocation8 + $0xc8] ss:$24 sps:$4 sm:$0xff]   ;;  %v2697_v63 = vld [vmem:[#allocation8 + $0xfc] ss:$24 sps:$4 sm:$0xff]  }
  0x7e   :  { %v2703_v1 = vld [vmem:[#allocation8 + $0x12c] ss:$24 sps:$4 sm:$0xff]   ;;  %v2701_v2 = vld [vmem:[#allocation8 + $0x128] ss:$24 sps:$4 sm:$0xff]   ;;  %v2709_v3 = vld [vmem:[#allocation8 + $0x15c] ss:$24 sps:$4 sm:$0xff]  }
  0x7f   :  { %300 = vmatpush1.bf16.msra.mxu1 %v2313_v25  ;;  %v2707_v4 = vld [vmem:[#allocation8 + $0x158] ss:$24 sps:$4 sm:$0xff]   ;;  %v2715_v5 = vld [vmem:[#allocation8 + $0x18c] ss:$24 sps:$4 sm:$0xff]   ;;  %v2713_v6 = vld [vmem:[#allocation8 + $0x188] ss:$24 sps:$4 sm:$0xff]  }
  0x80   :  { %338 = vmatprep.subr.bf16.mxu1 %v2308_v26  ;;  %1635 = vmatpush1.bf16.msra.mxu0 %v2686_v35  ;;  %v2717_v7 = vld [vmem:[#allocation8 + $0x1b4] ss:$24 sps:$4 sm:$0xff]   ;;  %v2719_v9 = vld [vmem:[#allocation8 + $0x1b8] ss:$24 sps:$4 sm:$0xff]   ;;  %v2725_v13 = vld [vmem:[#allocation8 + $0x1e8] ss:$24 sps:$4 sm:$0xff]  }
  0x81   :  { %1636 = vmatprep.subr.bf16.mxu0 %v2687_v36  ;;  %v2721_v8 = vld [vmem:[#allocation8 + $0x1bc] ss:$24 sps:$4 sm:$0xff]   ;;  %v2722_v10 = vld [vmem:[#allocation8 + $0x1b0] ss:$24 sps:$4 sm:$0xff]   ;;  %v2727_v12 = vld [vmem:[#allocation8 + $0x1ec] ss:$24 sps:$4 sm:$0xff]  }
  0x82   :  { %2320 = vmatmul.mubr.msk.bf16.vlgmr.msra.gmra.mrb[4].mxu1 %vm252_vm0, %v3286_v16  ;;  %v2728_v14 = vld [vmem:[#allocation8 + $0x1e0] ss:$24 sps:$4 sm:$0xff]   ;;  %v2729_v15 = vld [vmem:[#allocation8 + $0x214] ss:$24 sps:$4 sm:$0xff]   ;;  %v2734_v18 = vld [vmem:[#allocation8 + $0x210] ss:$24 sps:$4 sm:$0xff]  }
  0x83   :  { %339 = vmatpush1.bf16.msra.mxu1 %v2307_v31  ;;  %370 = vmatprep.mubr.bf16.mxu1 %v3159_v0  ;;  %v2731_v17 = vld [vmem:[#allocation8 + $0x218] ss:$24 sps:$4 sm:$0xff]   ;;  %v2735_v19 = vld [vmem:[#allocation8 + $0x244] ss:$24 sps:$4 sm:$0xff]   ;;  %v2737_v21 = vld [vmem:[#allocation8 + $0x248] ss:$24 sps:$4 sm:$0xff]  }
  0x84   :  { %340 = vmatprep.subr.bf16.mxu1 %v2316_v32  ;;  %1637 = vmatpush1.bf16.msra.mxu0 %v2692_v41  ;;  %v2739_v20 = vld [vmem:[#allocation8 + $0x24c] ss:$24 sps:$4 sm:$0xff]   ;;  %v2740_v22 = vld [vmem:[#allocation8 + $0x240] ss:$24 sps:$4 sm:$0xff]   ;;  %v2745_v24 = vld [vmem:[#allocation8 + $0x27c] ss:$24 sps:$4 sm:$0xff]  }
  0x85   :  { %1638 = vmatprep.subr.bf16.mxu0 %v2693_v42  ;;  %v2741_v23 = vld [vmem:[#allocation8 + $0x274] ss:$24 sps:$4 sm:$0xff]   ;;  %v2743_v25 = vld [vmem:[#allocation8 + $0x278] ss:$24 sps:$4 sm:$0xff]   ;;  %v2747_v27 = vld [vmem:[#allocation8 + $0x2a4] ss:$24 sps:$4 sm:$0xff]  }
  0x86   :  { %v2746_v26 = vld [vmem:[#allocation8 + $0x270] ss:$24 sps:$4 sm:$0xff]   ;;  %v2751_v28 = vld [vmem:[#allocation8 + $0x2ac] ss:$24 sps:$4 sm:$0xff]   ;;  %v2752_v30 = vld [vmem:[#allocation8 + $0x2a0] ss:$24 sps:$4 sm:$0xff]  }
  0x87   :  { %341 = vmatpush1.bf16.msra.mxu1 %v2315_v37  ;;  %v2749_v29 = vld [vmem:[#allocation8 + $0x2a8] ss:$24 sps:$4 sm:$0xff]   ;;  %v2753_v31 = vld [vmem:[#allocation8 + $0x2d4] ss:$24 sps:$4 sm:$0xff]   ;;  %v2755_v33 = vld [vmem:[#allocation8 + $0x2d8] ss:$24 sps:$4 sm:$0xff]   ;;  %v132_v37 = vlaneseq }
  0x88   :  { %379 = vmatprep.subr.bf16.mxu1 %v2310_v38  ;;  %1639 = vmatpush1.bf16.msra.mxu0 %v2698_v45  ;;  %v2757_v32 = vld [vmem:[#allocation8 + $0x2dc] ss:$24 sps:$4 sm:$0xff]   ;;  %v2758_v34 = vld [vmem:[#allocation8 + $0x2d0] ss:$24 sps:$4 sm:$0xff]   ;;  %v2764_v36 = vld [vmem:[#allocation8 + $0x30c] ss:$24 sps:$4 sm:$0xff]  }
  0x89   :  { %1640 = vmatprep.subr.bf16.mxu0 %v2699_v46  ;;  %v2761_v35 = vld [vmem:[#allocation8 + $0x304] ss:$24 sps:$4 sm:$0xff]   ;;  %v3299_v39 = vshrl.u32 %v132_v37, 7 }
  0x8a   :  { %2321 = vmatmul.mubr.msk.bf16.vlgmr.msra.gmra.mrb[8].mxu1 %vm252_vm0, %v3286_v16 }
  0x8b   :  { %380 = vmatpush1.bf16.msra.mxu1 %v2309_v43  ;;  %411 = vmatprep.mubr.bf16.mxu1 %v3159_v0  ;;  %v2695_v0 = vld [vmem:[#allocation8 + $0xf8] ss:$24 sps:$4 sm:$0xff]   ;;  %v134_v43 = vsub.s32 0, %v3299_v39  ;;  %v138_v45 = vsub.s32 1, %v3299_v39 }
  0x8c   :  { %381 = vmatprep.subr.bf16.mxu1 %v2318_v44  ;;  %1641 = vmatpush1.bf16.msra.mxu0 %v2704_v49  ;;  %v130_v44 = vld [vmem:[#allocation7] sm:$0xff]  ;;  %v150_v49 = vsub.s32 4, %v3299_v39 }
  0x8d   :  { %1642 = vmatprep.subr.bf16.mxu0 %v2705_v50  ;;  %v139_v50 = vrot.slane %v130_v44, %v138_v45 }
  0x8f   :  { %382 = vmatpush1.bf16.msra.mxu1 %v2317_v47  ;;  %v135_v47 = vrot.slane %v130_v44, %v134_v43 }
  0x90   :  { %1710 = vmatprep.subr.bf16.mxu1 %v2667_v48  ;;  %1643 = vmatpush1.bf16.msra.mxu0 %v2710_v53 }
  0x91   :  { %1644 = vmatprep.subr.bf16.mxu0 %v2711_v54 }
  0x92   :  { %2322 = vmatmul.mubr.msk.bf16.vlgmr.msra.gmra.mrb[12].mxu1 %vm252_vm0, %v3286_v16  ;;  %v2733_v16 = vld [vmem:[#allocation8 + $0x21c] ss:$24 sps:$4 sm:$0xff]  }
  0x93   :  { %1711 = vmatpush1.bf16.msra.mxu1 %v2665_v51 }
  0x94   :  { %1712 = vmatprep.subr.bf16.mxu1 %v2673_v52  ;;  %1645 = vmatpush1.bf16.msra.mxu0 %v2716_v57  ;;  %v154_v52 = vsub.s32 5, %v3299_v39 }
  0x95   :  { %1646 = vmatprep.subr.bf16.mxu0 %v2717_v7 }
  0x97   :  { %1713 = vmatpush1.bf16.msra.mxu1 %v2671_v55  ;;  %v142_v55 = vsub.s32 2, %v3299_v39 }
  0x98   :  { %1714 = vmatprep.subr.bf16.mxu1 %v2679_v56  ;;  %1647 = vmatpush1.bf16.msra.mxu0 %v2722_v10  ;;  %v151_v56 = vrot.slane %v130_v44, %v150_v49 }
  0x99   :  { %1648 = vmatprep.subr.bf16.mxu0 %v2723_v11 }
  0x9b   :  { %1715 = vmatpush1.bf16.msra.mxu1 %v2677_v58  ;;  %v146_v58 = vsub.s32 3, %v3299_v39 }
  0x9c   :  { %1716 = vmatprep.subr.bf16.mxu1 %v2685_v59  ;;  %1649 = vmatpush1.bf16.msra.mxu0 %v2728_v14  ;;  %v155_v59 = vrot.slane %v130_v44, %v154_v52 }
  0x9d   :  { %1650 = vmatprep.subr.bf16.mxu0 %v2729_v15 }
  0x9f   :  { %1717 = vmatpush1.bf16.msra.mxu1 %v2683_v60 }
  0xa0   :  { %1718 = vmatprep.subr.bf16.mxu1 %v2691_v61  ;;  %1651 = vmatpush1.bf16.msra.mxu0 %v2734_v18 }
  0xa1   :  { %1652 = vmatprep.subr.bf16.mxu0 %v2735_v19 }
  0xa3   :  { %1719 = vmatpush1.bf16.msra.mxu1 %v2689_v62  ;;  %v143_v62 = vrot.slane %v130_v44, %v142_v55 }
  0xa4   :  { %1720 = vmatprep.subr.bf16.mxu1 %v2697_v63  ;;  %1653 = vmatpush1.bf16.msra.mxu0 %v2740_v22 }
  0xa5   :  { %1654 = vmatprep.subr.bf16.mxu0 %v2741_v23 }
  0xa7   :  { %1721 = vmatpush1.bf16.msra.mxu1 %v2695_v0 }
  0xa8   :  { %1722 = vmatprep.subr.bf16.mxu1 %v2703_v1  ;;  %1655 = vmatpush1.bf16.msra.mxu0 %v2746_v26  ;;  %v158_v1 = vsub.s32 6, %v3299_v39 }
  0xa9   :  { %1656 = vmatprep.subr.bf16.mxu0 %v2747_v27 }
  0xab   :  { %1723 = vmatpush1.bf16.msra.mxu1 %v2701_v2 }
  0xac   :  { %1724 = vmatprep.subr.bf16.mxu1 %v2709_v3  ;;  %1657 = vmatpush1.bf16.msra.mxu0 %v2752_v30  ;;  %v147_v3 = vrot.slane %v130_v44, %v146_v58 }
  0xad   :  { %1658 = vmatprep.subr.bf16.mxu0 %v2753_v31 }
  0xaf   :  { %1725 = vmatpush1.bf16.msra.mxu1 %v2707_v4 }
  0xb0   :  { %1726 = vmatprep.subr.bf16.mxu1 %v2715_v5  ;;  %1659 = vmatpush1.bf16.msra.mxu0 %v2758_v34 }
  0xb1   :  { %1669 = vmatprep.subr.bf16.mxu0 %v2761_v35 }
  0xb3   :  { %1727 = vmatpush1.bf16.msra.mxu1 %v2713_v6  ;;  %v162_v6 = vsub.s32 7, %v3299_v39 }
  0xb4   :  { %1728 = vmatprep.subr.bf16.mxu1 %v2721_v8 }
  0xb7   :  { %1729 = vmatpush1.bf16.msra.mxu1 %v2719_v9 }
  0xb8   :  { %1730 = vmatprep.subr.bf16.mxu1 %v2727_v12 }
  0xbb   :  { %1731 = vmatpush1.bf16.msra.mxu1 %v2725_v13  ;;  %v159_v13 = vrot.slane %v130_v44, %v158_v1  ;;  %v2794_v1 = vld [vmem:[#allocation8 + $0x3fc] ss:$24 sps:$4 sm:$0xff]  }
  0xbc   :  { %1732 = vmatprep.subr.bf16.mxu1 %v2733_v16 }
  0xbf   :  { %1733 = vmatpush1.bf16.msra.mxu1 %v2731_v17  ;;  %v163_v17 = vrot.slane %v130_v44, %v162_v6  ;;  %v2795_v6 = vld [vmem:[#allocation8 + $0x420] ss:$24 sps:$4 sm:$0xff]  }
  0xc0   :  { %1734 = vmatprep.subr.bf16.mxu1 %v2739_v20 }
  0xc3   :  { %1735 = vmatpush1.bf16.msra.mxu1 %v2737_v21  ;;  %v2759_v21 = vld [vmem:[#allocation8 + $0x300] ss:$24 sps:$4 sm:$0xff]  }
  0xc4   :  { %1736 = vmatprep.subr.bf16.mxu1 %v2745_v24 }
  0xc7   :  { %1737 = vmatpush1.bf16.msra.mxu1 %v2743_v25  ;;  %v2762_v25 = vld [vmem:[#allocation8 + $0x308] ss:$24 sps:$4 sm:$0xff]  }
  0xc8   :  { %1738 = vmatprep.subr.bf16.mxu1 %v2751_v28 }
  0xcb   :  { %1739 = vmatpush1.bf16.msra.mxu1 %v2749_v29  ;;  %v2767_v29 = vld [vmem:[#allocation8 + $0x334] ss:$24 sps:$4 sm:$0xff]  }
  0xcc   :  { %1740 = vmatprep.subr.bf16.mxu1 %v2757_v32 }
  0xcf   :  { %1741 = vmatpush1.bf16.msra.mxu1 %v2755_v33  ;;  %v2770_v33 = vld [vmem:[#allocation8 + $0x33c] ss:$24 sps:$4 sm:$0xff]  }
  0xd0   :  { %1751 = vmatprep.subr.bf16.mxu1 %v2764_v36 }
 0x14d   :  { %v290_v38 = vpop.f32.mrb[0].mxu1 }
 0x14e   :  { %v292_v40 = vpop.f32.mrb[1].mxu1  ;;  %v291_v54 = vadd.f32 %v290_v38, %v135_v47  ;;  %v2776_v47 = vld [vmem:[#allocation8 + $0x36c] ss:$24 sps:$4 sm:$0xff]  }
 0x14f   :  { %v294_v41 = vpop.f32.mrb[2].mxu1  ;;  %v293_v57 = vadd.f32 %v292_v40, %v139_v50  ;;  %v2771_v50 = vld [vmem:[#allocation8 + $0x360] ss:$24 sps:$4 sm:$0xff]  }
 0x150   :  { %v295_v42 = vpop.f32.mrb[3].mxu1  ;;  %v420_v61 = vmul.f32 0.01, %v291_v54  ;;  %v2765_v41 = vld [vmem:[#allocation8 + $0x330] ss:$24 sps:$4 sm:$0xff]  }
 0x151   :  { %v421_v2 = vmul.f32 0.01, %v293_v57  ;;  %v2768_v42 = vld [vmem:[#allocation8 + $0x338] ss:$24 sps:$4 sm:$0xff]  }
 0x152   :  { %v428_v10 = vmax.f32 %v291_v54, %v420_v61  ;;  %v2779_v54 = vld [vmem:[#allocation8 + $0x394] ss:$24 sps:$4 sm:$0xff]  }
 0x153   :  { %v429_v14 = vmax.f32 %v293_v57, %v421_v2  ;;  %v2777_v57 = vld [vmem:[#allocation8 + $0x390] ss:$24 sps:$4 sm:$0xff]   ;;  %v2788_v61 = vld [vmem:[#allocation8 + $0x3cc] ss:$24 sps:$4 sm:$0xff]  }
 0x154   :  { %v2789_v2 = vld [vmem:[#allocation8 + $0x3f0] ss:$24 sps:$4 sm:$0xff]  }
 0x155   :  { %v331_v46 = vpop.f32.mrb[4].mxu1 }
 0x156   :  { %v333_v48 = vpop.f32.mrb[5].mxu1  ;;  %v332_v11 = vadd.f32 %v331_v46, %v143_v62  ;;  %v2773_v46 = vld [vmem:[#allocation8 + $0x364] ss:$24 sps:$4 sm:$0xff]   ;;  %v2783_v62 = vld [vmem:[#allocation8 + $0x3c0] ss:$24 sps:$4 sm:$0xff]  }
 0x157   :  { %v335_v51 = vpop.f32.mrb[6].mxu1  ;;  %v334_v15 = vadd.f32 %v333_v48, %v147_v3  ;;  %v2792_v3 = vld [vmem:[#allocation8 + $0x3f8] ss:$24 sps:$4 sm:$0xff]  }
 0x158   :  { %v336_v53 = vpop.f32.mrb[7].mxu1  ;;  %v422_v22 = vmul.f32 0.01, %v332_v11 }
 0x159   :  { %v423_v26 = vmul.f32 0.01, %v334_v15  ;;  %v2774_v53 = vld [vmem:[#allocation8 + $0x368] ss:$24 sps:$4 sm:$0xff]  }
 0x15a   :  { %v430_v36 = vmax.f32 %v332_v11, %v422_v22  ;;  %v2804_v11 = vld [vmem:[#allocation8 + $0x458] ss:$24 sps:$4 sm:$0xff]  }
 0x15b   :  { %v431_v38 = vmax.f32 %v334_v15, %v423_v26  ;;  %v2810_v15 = vld [vmem:[#allocation8 + $0x488] ss:$24 sps:$4 sm:$0xff]  }
 0x15c   :  { %v2819_v22 = vld [vmem:[#allocation8 + $0x4e0] ss:$24 sps:$4 sm:$0xff]   ;;  %v2825_v26 = vld [vmem:[#allocation8 + $0x510] ss:$24 sps:$4 sm:$0xff]  }
 0x15d   :  { %v372_v60 = vpop.f32.mrb[8].mxu1 }
 0x15e   :  { %v373_v63 = vadd.f32 %v372_v60, %v151_v56  ;;  %v374_v0 = vpop.f32.mrb[9].mxu1  ;;  %v2782_v56 = vld [vmem:[#allocation8 + $0x39c] ss:$24 sps:$4 sm:$0xff]  }
 0x15f   :  { %v375_v4 = vadd.f32 %v374_v0, %v155_v59  ;;  %v376_v5 = vpop.f32.mrb[10].mxu1  ;;  %v2780_v59 = vld [vmem:[#allocation8 + $0x398] ss:$24 sps:$4 sm:$0xff]   ;;  %v2785_v60 = vld [vmem:[#allocation8 + $0x3c4] ss:$24 sps:$4 sm:$0xff]  }
 0x160   :  { %v424_v7 = vmul.f32 0.01, %v373_v63  ;;  %v377_v8 = vpop.f32.mrb[11].mxu1  ;;  %v2791_v0 = vld [vmem:[#allocation8 + $0x3f4] ss:$24 sps:$4 sm:$0xff]  }
 0x161   :  { %v425_v9 = vmul.f32 0.01, %v375_v4  ;;  %v2800_v5 = vld [vmem:[#allocation8 + $0x42c] ss:$24 sps:$4 sm:$0xff]  }
 0x162   :  { %v432_v12 = vmax.f32 %v373_v63, %v424_v7  ;;  %v2786_v63 = vld [vmem:[#allocation8 + $0x3c8] ss:$24 sps:$4 sm:$0xff]   ;;  %v2803_v8 = vld [vmem:[#allocation8 + $0x454] ss:$24 sps:$4 sm:$0xff]  }
 0x163   :  { %v433_v16 = vmax.f32 %v375_v4, %v425_v9  ;;  %v2797_v4 = vld [vmem:[#allocation8 + $0x424] ss:$24 sps:$4 sm:$0xff]   ;;  %v2798_v7 = vld [vmem:[#allocation8 + $0x428] ss:$24 sps:$4 sm:$0xff]  }
 0x164   :  { %v436_v18 = vmax.f32 %v428_v10, %v432_v12  ;;  %v2806_v9 = vld [vmem:[#allocation8 + $0x45c] ss:$24 sps:$4 sm:$0xff]   ;;  %v2801_v10 = vld [vmem:[#allocation8 + $0x450] ss:$24 sps:$4 sm:$0xff]  }
 0x165   :  { %v413_v19 = vpop.f32.mrb[12].mxu1  ;;  %v437_v20 = vmax.f32 %v429_v14, %v433_v16  ;;  %v2809_v12 = vld [vmem:[#allocation8 + $0x484] ss:$24 sps:$4 sm:$0xff]   ;;  %v2807_v14 = vld [vmem:[#allocation8 + $0x480] ss:$24 sps:$4 sm:$0xff]  }
 0x166   :  { %v414_v23 = vadd.f32 %v413_v19, %v159_v13  ;;  %v415_v24 = vpop.f32.mrb[13].mxu1  ;;  %v3323_v32 = vpack.c.bf16 %v436_v18, %v436_v18  ;;  %v2812_v13 = vld [vmem:[#allocation8 + $0x48c] ss:$24 sps:$4 sm:$0xff]   ;;  %v2813_v18 = vld [vmem:[#allocation8 + $0x4b0] ss:$24 sps:$4 sm:$0xff]  }
 0x167   :  { %v416_v27 = vadd.f32 %v415_v24, %v163_v17  ;;  %v3321_v28 = vpack.c.bf16 %v437_v20, %v437_v20  ;;  %v417_v30 = vpop.f32.mrb[14].mxu1  ;;  %v2815_v16 = vld [vmem:[#allocation8 + $0x4b4] ss:$24 sps:$4 sm:$0xff]   ;;  %v2816_v19 = vld [vmem:[#allocation8 + $0x4b8] ss:$24 sps:$4 sm:$0xff]  }
 0x168   :  { %v426_v31 = vmul.f32 0.01, %v414_v23  ;;  %v418_v34 = vpop.f32.mrb[15].mxu1  ;;  %v2818_v17 = vld [vmem:[#allocation8 + $0x4bc] ss:$24 sps:$4 sm:$0xff]  }
 0x169   :  { %v427_v35 = vmul.f32 0.01, %v416_v27  ;;  %1660 = vmatprep.mubr.bf16.mxu0 %v3321_v28  ;;  %1742 = vmatprep.mubr.bf16.mxu1 %v3321_v28  ;;  %v2821_v20 = vld [vmem:[#allocation8 + $0x4e4] ss:$24 sps:$4 sm:$0xff]   ;;  %v2827_v24 = vld [vmem:[#allocation8 + $0x514] ss:$24 sps:$4 sm:$0xff]  }
 0x16a   :  { %v434_v37 = vmax.f32 %v414_v23, %v426_v31  ;;  %1661 = vmatmul.mubr.bf16.vlgmr.msra.gmra.mrb[0].mxu0 %v3323_v32  ;;  %1743 = vmatmul.mubr.bf16.vlgmr.msra.gmra.mrb[16].mxu1 %v3323_v32  ;;  %v2822_v23 = vld [vmem:[#allocation8 + $0x4e8] ss:$24 sps:$4 sm:$0xff]   ;;  %v2836_v30 = vld [vmem:[#allocation8 + $0x54c] ss:$24 sps:$4 sm:$0xff]  }
 0x16b   :  { %v435_v40 = vmax.f32 %v416_v27, %v427_v35  ;;  %1670 = vmatpush1.bf16.msra.mxu0 %v2759_v21  ;;  %1752 = vmatpush1.bf16.msra.mxu1 %v2762_v25  ;;  %v2824_v21 = vld [vmem:[#allocation8 + $0x4ec] ss:$24 sps:$4 sm:$0xff]   ;;  %v2830_v25 = vld [vmem:[#allocation8 + $0x51c] ss:$24 sps:$4 sm:$0xff]   ;;  %v2828_v27 = vld [vmem:[#allocation8 + $0x518] ss:$24 sps:$4 sm:$0xff]  }
 0x16c   :  { %v3329_v44 = vmax.f32 %v430_v36, %v434_v37  ;;  %1671 = vmatprep.subr.bf16.mxu0 %v2767_v29  ;;  %1753 = vmatprep.subr.bf16.mxu1 %v2770_v33  ;;  %v2833_v29 = vld [vmem:[#allocation8 + $0x544] ss:$24 sps:$4 sm:$0xff]   ;;  %v2831_v31 = vld [vmem:[#allocation8 + $0x540] ss:$24 sps:$4 sm:$0xff]   ;;  %v2839_v34 = vld [vmem:[#allocation8 + $0x574] ss:$24 sps:$4 sm:$0xff]  }
 0x16d   :  { %v439_v48 = vmax.f32 %v431_v38, %v435_v40  ;;  %v2834_v33 = vld [vmem:[#allocation8 + $0x548] ss:$24 sps:$4 sm:$0xff]   ;;  %v2842_v35 = vld [vmem:[#allocation8 + $0x57c] ss:$24 sps:$4 sm:$0xff]   ;;  %v2840_v37 = vld [vmem:[#allocation8 + $0x578] ss:$24 sps:$4 sm:$0xff]  }
 0x16e   :  { %v2837_v36 = vld [vmem:[#allocation8 + $0x570] ss:$24 sps:$4 sm:$0xff]   ;;  %v2845_v38 = vld [vmem:[#allocation8 + $0x5a4] ss:$24 sps:$4 sm:$0xff]  }
 0x16f   :  { %1672 = vmatpush1.bf16.msra.mxu0 %v2765_v41  ;;  %1754 = vmatpush1.bf16.msra.mxu1 %v2768_v42  ;;  %v3331_v51 = vpack.c.bf16 %v439_v48, %v439_v48  ;;  %v2848_v40 = vld [vmem:[#allocation8 + $0x5ac] ss:$24 sps:$4 sm:$0xff]   ;;  %v2843_v41 = vld [vmem:[#allocation8 + $0x5a0] ss:$24 sps:$4 sm:$0xff]   ;;  %v2849_v48 = vld [vmem:[#allocation8 + $0x5d0] ss:$24 sps:$4 sm:$0xff]  }
 0x170   :  { %1673 = vmatprep.subr.bf16.mxu0 %v2773_v46  ;;  %1755 = vmatprep.subr.bf16.mxu1 %v2776_v47  ;;  %v2846_v42 = vld [vmem:[#allocation8 + $0x5a8] ss:$24 sps:$4 sm:$0xff]   ;;  %v2851_v46 = vld [vmem:[#allocation8 + $0x5d4] ss:$24 sps:$4 sm:$0xff]  }
 0x171   :  { %1701 = vmatprep.mubr.bf16.mxu0 %v3331_v51  ;;  %1783 = vmatprep.mubr.bf16.mxu1 %v3331_v51  ;;  %v2854_v47 = vld [vmem:[#allocation8 + $0x5dc] ss:$24 sps:$4 sm:$0xff]  }
 0x173   :  { %1674 = vmatpush1.bf16.msra.mxu0 %v2771_v50  ;;  %1756 = vmatpush1.bf16.msra.mxu1 %v2774_v53  ;;  %v2852_v50 = vld [vmem:[#allocation8 + $0x5d8] ss:$24 sps:$4 sm:$0xff]   ;;  %v2857_v53 = vld [vmem:[#allocation8 + $0x14] ss:$24 sps:$4 sm:$0xff]  }
 0x174   :  { %1675 = vmatprep.subr.bf16.mxu0 %v2779_v54  ;;  %1757 = vmatprep.subr.bf16.mxu1 %v2782_v56  ;;  %v2855_v54 = vld [vmem:[#allocation8 + $0x10] ss:$24 sps:$4 sm:$0xff]   ;;  %v3337_v56 = vpack.c.bf16 %v3329_v44, %v3329_v44  ;;  %v2869_v44 = vld [vmem:[#allocation8 + $0xd4] ss:$24 sps:$4 sm:$0xff]  }
 0x177   :  { %1676 = vmatpush1.bf16.msra.mxu0 %v2777_v57  ;;  %1758 = vmatpush1.bf16.msra.mxu1 %v2780_v59  ;;  %v2860_v57 = vld [vmem:[#allocation8 + $0x44] ss:$24 sps:$4 sm:$0xff]   ;;  %v2858_v59 = vld [vmem:[#allocation8 + $0x40] ss:$24 sps:$4 sm:$0xff]  }
 0x178   :  { %1677 = vmatprep.subr.bf16.mxu0 %v2785_v60  ;;  %1759 = vmatprep.subr.bf16.mxu1 %v2788_v61  ;;  %v2863_v60 = vld [vmem:[#allocation8 + $0x74] ss:$24 sps:$4 sm:$0xff]   ;;  %v2861_v61 = vld [vmem:[#allocation8 + $0x70] ss:$24 sps:$4 sm:$0xff]  }
 0x17b   :  { %1678 = vmatpush1.bf16.msra.mxu0 %v2783_v62  ;;  %1760 = vmatpush1.bf16.msra.mxu1 %v2786_v63  ;;  %v2866_v62 = vld [vmem:[#allocation8 + $0xa4] ss:$24 sps:$4 sm:$0xff]   ;;  %v2864_v63 = vld [vmem:[#allocation8 + $0xa0] ss:$24 sps:$4 sm:$0xff]  }
 0x17c   :  { %1679 = vmatprep.subr.bf16.mxu0 %v2791_v0  ;;  %1761 = vmatprep.subr.bf16.mxu1 %v2794_v1  ;;  %v2867_v0 = vld [vmem:[#allocation8 + $0xd0] ss:$24 sps:$4 sm:$0xff]   ;;  %v2872_v1 = vld [vmem:[#allocation8 + $0x104] ss:$24 sps:$4 sm:$0xff]  }
 0x17f   :  { %1680 = vmatpush1.bf16.msra.mxu0 %v2789_v2  ;;  %1762 = vmatpush1.bf16.msra.mxu1 %v2792_v3  ;;  %v2870_v2 = vld [vmem:[#allocation8 + $0x100] ss:$24 sps:$4 sm:$0xff]   ;;  %v2875_v3 = vld [vmem:[#allocation8 + $0x134] ss:$24 sps:$4 sm:$0xff]  }
 0x180   :  { %1681 = vmatprep.subr.bf16.mxu0 %v2797_v4  ;;  %1763 = vmatprep.subr.bf16.mxu1 %v2800_v5  ;;  %v2878_v4 = vld [vmem:[#allocation8 + $0x164] ss:$24 sps:$4 sm:$0xff]   ;;  %v2876_v5 = vld [vmem:[#allocation8 + $0x160] ss:$24 sps:$4 sm:$0xff]  }
 0x183   :  { %1682 = vmatpush1.bf16.msra.mxu0 %v2795_v6  ;;  %1764 = vmatpush1.bf16.msra.mxu1 %v2798_v7  ;;  %v2881_v6 = vld [vmem:[#allocation8 + $0x194] ss:$24 sps:$4 sm:$0xff]   ;;  %v2879_v7 = vld [vmem:[#allocation8 + $0x190] ss:$24 sps:$4 sm:$0xff]  }
 0x184   :  { %1683 = vmatprep.subr.bf16.mxu0 %v2803_v8  ;;  %1765 = vmatprep.subr.bf16.mxu1 %v2806_v9  ;;  %v2884_v8 = vld [vmem:[#allocation8 + $0x1c4] ss:$24 sps:$4 sm:$0xff]   ;;  %v2882_v9 = vld [vmem:[#allocation8 + $0x1c0] ss:$24 sps:$4 sm:$0xff]  }
 0x187   :  { %1684 = vmatpush1.bf16.msra.mxu0 %v2801_v10  ;;  %1766 = vmatpush1.bf16.msra.mxu1 %v2804_v11  ;;  %v2887_v10 = vld [vmem:[#allocation8 + $0x1f4] ss:$24 sps:$4 sm:$0xff]   ;;  %v2885_v11 = vld [vmem:[#allocation8 + $0x1f0] ss:$24 sps:$4 sm:$0xff]  }
 0x188   :  { %1685 = vmatprep.subr.bf16.mxu0 %v2809_v12  ;;  %1767 = vmatprep.subr.bf16.mxu1 %v2812_v13  ;;  %v2890_v12 = vld [vmem:[#allocation8 + $0x224] ss:$24 sps:$4 sm:$0xff]   ;;  %v2888_v13 = vld [vmem:[#allocation8 + $0x220] ss:$24 sps:$4 sm:$0xff]  }
 0x18b   :  { %1686 = vmatpush1.bf16.msra.mxu0 %v2807_v14  ;;  %1768 = vmatpush1.bf16.msra.mxu1 %v2810_v15  ;;  %v2893_v14 = vld [vmem:[#allocation8 + $0x254] ss:$24 sps:$4 sm:$0xff]   ;;  %v2891_v15 = vld [vmem:[#allocation8 + $0x250] ss:$24 sps:$4 sm:$0xff]  }
 0x18c   :  { %1687 = vmatprep.subr.bf16.mxu0 %v2815_v16  ;;  %1769 = vmatprep.subr.bf16.mxu1 %v2818_v17  ;;  %v2896_v16 = vld [vmem:[#allocation8 + $0x284] ss:$24 sps:$4 sm:$0xff]   ;;  %v2894_v17 = vld [vmem:[#allocation8 + $0x280] ss:$24 sps:$4 sm:$0xff]  }
 0x18f   :  { %1688 = vmatpush1.bf16.msra.mxu0 %v2813_v18  ;;  %1770 = vmatpush1.bf16.msra.mxu1 %v2816_v19  ;;  %v2899_v18 = vld [vmem:[#allocation8 + $0x2b4] ss:$24 sps:$4 sm:$0xff]   ;;  %v2897_v19 = vld [vmem:[#allocation8 + $0x2b0] ss:$24 sps:$4 sm:$0xff]  }
 0x190   :  { %1689 = vmatprep.subr.bf16.mxu0 %v2821_v20  ;;  %1771 = vmatprep.subr.bf16.mxu1 %v2824_v21  ;;  %v2902_v20 = vld [vmem:[#allocation8 + $0x2e4] ss:$24 sps:$4 sm:$0xff]   ;;  %v2900_v21 = vld [vmem:[#allocation8 + $0x2e0] ss:$24 sps:$4 sm:$0xff]  }
 0x193   :  { %1690 = vmatpush1.bf16.msra.mxu0 %v2819_v22  ;;  %1772 = vmatpush1.bf16.msra.mxu1 %v2822_v23  ;;  %v2905_v22 = vld [vmem:[#allocation8 + $0x314] ss:$24 sps:$4 sm:$0xff]   ;;  %v2903_v23 = vld [vmem:[#allocation8 + $0x310] ss:$24 sps:$4 sm:$0xff]  }
 0x194   :  { %1691 = vmatprep.subr.bf16.mxu0 %v2827_v24  ;;  %1773 = vmatprep.subr.bf16.mxu1 %v2830_v25  ;;  %v2908_v24 = vld [vmem:[#allocation8 + $0x344] ss:$24 sps:$4 sm:$0xff]   ;;  %v2906_v25 = vld [vmem:[#allocation8 + $0x340] ss:$24 sps:$4 sm:$0xff]  }
 0x197   :  { %1692 = vmatpush1.bf16.msra.mxu0 %v2825_v26  ;;  %1774 = vmatpush1.bf16.msra.mxu1 %v2828_v27  ;;  %v2911_v26 = vld [vmem:[#allocation8 + $0x374] ss:$24 sps:$4 sm:$0xff]   ;;  %v2909_v27 = vld [vmem:[#allocation8 + $0x370] ss:$24 sps:$4 sm:$0xff]  }
 0x198   :  { %1693 = vmatprep.subr.bf16.mxu0 %v2833_v29  ;;  %1775 = vmatprep.subr.bf16.mxu1 %v2836_v30  ;;  %v2914_v29 = vld [vmem:[#allocation8 + $0x3a4] ss:$24 sps:$4 sm:$0xff]   ;;  %v2912_v30 = vld [vmem:[#allocation8 + $0x3a0] ss:$24 sps:$4 sm:$0xff]  }
 0x19b   :  { %1694 = vmatpush1.bf16.msra.mxu0 %v2831_v31  ;;  %1776 = vmatpush1.bf16.msra.mxu1 %v2834_v33  ;;  %v2917_v31 = vld [vmem:[#allocation8 + $0x3d4] ss:$24 sps:$4 sm:$0xff]   ;;  %v2915_v33 = vld [vmem:[#allocation8 + $0x3d0] ss:$24 sps:$4 sm:$0xff]  }
 0x19c   :  { %1695 = vmatprep.subr.bf16.mxu0 %v2839_v34  ;;  %1777 = vmatprep.subr.bf16.mxu1 %v2842_v35  ;;  %v2920_v34 = vld [vmem:[#allocation8 + $0x404] ss:$24 sps:$4 sm:$0xff]   ;;  %v2923_v35 = vld [vmem:[#allocation8 + $0x434] ss:$24 sps:$4 sm:$0xff]  }
 0x19f   :  { %1696 = vmatpush1.bf16.msra.mxu0 %v2837_v36  ;;  %1778 = vmatpush1.bf16.msra.mxu1 %v2840_v37  ;;  %v2926_v36 = vld [vmem:[#allocation8 + $0x464] ss:$24 sps:$4 sm:$0xff]   ;;  %v2924_v37 = vld [vmem:[#allocation8 + $0x460] ss:$24 sps:$4 sm:$0xff]  }
 0x1a0   :  { %1697 = vmatprep.subr.bf16.mxu0 %v2845_v38  ;;  %1779 = vmatprep.subr.bf16.mxu1 %v2848_v40  ;;  %v2929_v38 = vld [vmem:[#allocation8 + $0x494] ss:$24 sps:$4 sm:$0xff]   ;;  %v2927_v40 = vld [vmem:[#allocation8 + $0x490] ss:$24 sps:$4 sm:$0xff]  }
 0x1a3   :  { %1698 = vmatpush1.bf16.msra.mxu0 %v2843_v41  ;;  %1780 = vmatpush1.bf16.msra.mxu1 %v2846_v42  ;;  %v2951_v41 = vld [vmem:[#allocation10 + $0x40] sm:$0xff]  }
 0x1a4   :  { %1699 = vmatprep.subr.bf16.mxu0 %v2851_v46  ;;  %1781 = vmatprep.subr.bf16.mxu1 %v2854_v47  ;;  %v2952_v42 = vld [vmem:[#allocation10] sm:$0xff]   ;;  %v2953_v46 = vld [vmem:[#allocation10 + $0x48] sm:$0xff]  }
 0x1a5   :  { %v2932_v47 = vld [vmem:[#allocation8 + $0x4c4] ss:$24 sps:$4 sm:$0xff]  }
 0x1a7   :  { %1700 = vmatpush1.bf16.msra.mxu0 %v2849_v48  ;;  %1782 = vmatpush1.bf16.msra.mxu1 %v2852_v50  ;;  %v2954_v48 = vld [vmem:[#allocation10 + $0x8] sm:$0xff]   ;;  %v2930_v50 = vld [vmem:[#allocation8 + $0x4c0] ss:$24 sps:$4 sm:$0xff]  }
 0x1a8   :  { %1792 = vmatprep.subr.bf16.mxu0 %v2857_v53  ;;  %2549 = vmatprep.subr.bf16.mxu1 %v2951_v41  ;;  %v2955_v53 = vld [vmem:[#allocation10 + $0x50] sm:$0xff]  }
 0x1aa   :  { %1702 = vmatmul.mubr.bf16.vlgmr.msra.gmra.mrb[0].mxu0 %v3337_v56  ;;  %1784 = vmatmul.mubr.bf16.vlgmr.msra.gmra.mrb[16].mxu1 %v3337_v56 }
 0x1ab   :  { %1793 = vmatpush1.bf16.msra.mxu0 %v2855_v54  ;;  %1824 = vmatprep.mubr.bf16.mxu0 %v3321_v28  ;;  %v2873_v28 = vld [vmem:[#allocation8 + $0x130] ss:$24 sps:$4 sm:$0xff]   ;;  %v2935_v54 = vld [vmem:[#allocation8 + $0x4f4] ss:$24 sps:$4 sm:$0xff]  }
 0x1ac   :  { %1794 = vmatprep.subr.bf16.mxu0 %v2860_v57  ;;  %2550 = vmatpush3.bf16.msra.mxu1 %v2952_v42  ;;  %v2956_v57 = vld [vmem:[#allocation10 + $0x10] sm:$0xff]  }
 0x1ad   :  { %2551 = vmatprep.subr.bf16.mxu1 %v2953_v46 }
 0x1af   :  { %1795 = vmatpush1.bf16.msra.mxu0 %v2858_v59  ;;  %v2933_v59 = vld [vmem:[#allocation8 + $0x4f0] ss:$24 sps:$4 sm:$0xff]  }
 0x1b0   :  { %1796 = vmatprep.subr.bf16.mxu0 %v2863_v60  ;;  %2552 = vmatpush3.bf16.msra.mxu1 %v2954_v48  ;;  %v2957_v60 = vld [vmem:[#allocation10 + $0x58] sm:$0xff]  }
 0x1b1   :  { %2553 = vmatprep.subr.bf16.mxu1 %v2955_v53 }
 0x1b3   :  { %1797 = vmatpush1.bf16.msra.mxu0 %v2861_v61  ;;  %v2938_v61 = vld [vmem:[#allocation8 + $0x524] ss:$24 sps:$4 sm:$0xff]  }
 0x1b4   :  { %1798 = vmatprep.subr.bf16.mxu0 %v2866_v62  ;;  %2554 = vmatpush3.bf16.msra.mxu1 %v2956_v57  ;;  %v2958_v62 = vld [vmem:[#allocation10 + $0x18] sm:$0xff]  }
 0x1b5   :  { %2555 = vmatprep.subr.bf16.mxu1 %v2957_v60  ;;  %v2967_v60 = vld [vmem:[#allocation10 + $0x80] sm:$0xff]  }
 0x1b7   :  { %1799 = vmatpush1.bf16.msra.mxu0 %v2864_v63  ;;  %v2936_v63 = vld [vmem:[#allocation8 + $0x520] ss:$24 sps:$4 sm:$0xff]  }
 0x1b8   :  { %1800 = vmatprep.subr.bf16.mxu0 %v2869_v44  ;;  %v2959_v44 = vld [vmem:[#allocation10 + $0x60] sm:$0xff]   ;;  %2556 = vmatpush3.bf16.msra.mxu1 %v2958_v62  ;;  %v2970_v62 = vld [vmem:[#allocation10 + $0x98] sm:$0xff]  }
 0x1b9   :  { %2557 = vmatprep.subr.bf16.mxu1 %v2959_v44  ;;  %v2972_v44 = vld [vmem:[#allocation10 + $0xa8] sm:$0xff]  }
 0x1bb   :  { %1801 = vmatpush1.bf16.msra.mxu0 %v2867_v0  ;;  %v2941_v0 = vld [vmem:[#allocation8 + $0x554] ss:$24 sps:$4 sm:$0xff]  }
 0x1bc   :  { %1802 = vmatprep.subr.bf16.mxu0 %v2872_v1  ;;  %v2960_v1 = vld [vmem:[#allocation10 + $0x20] sm:$0xff]  }
 0x1bd   :  { %2558 = vmatpush3.bf16.msra.mxu1 %v2960_v1  ;;  %v2974_v1 = vld [vmem:[#allocation10 + $0xb8] sm:$0xff]  }
 0x1bf   :  { %1803 = vmatpush1.bf16.msra.mxu0 %v2870_v2  ;;  %v2939_v2 = vld [vmem:[#allocation8 + $0x550] ss:$24 sps:$4 sm:$0xff]  }
 0x1c0   :  { %1804 = vmatprep.subr.bf16.mxu0 %v2875_v3  ;;  %v2961_v3 = vld [vmem:[#allocation10 + $0x68] sm:$0xff]  }
 0x1c1   :  { %2559 = vmatprep.subr.bf16.mxu1 %v2961_v3  ;;  %v2975_v3 = vld [vmem:[#allocation11] sm:$0xff]  }
 0x1c3   :  { %1805 = vmatpush1.bf16.msra.mxu0 %v2873_v28  ;;  %v2944_v28 = vld [vmem:[#allocation8 + $0x584] ss:$24 sps:$4 sm:$0xff]  }
 0x1c4   :  { %1806 = vmatprep.subr.bf16.mxu0 %v2878_v4  ;;  %v2942_v4 = vld [vmem:[#allocation8 + $0x580] ss:$24 sps:$4 sm:$0xff]  }
 0x1c7   :  { %1807 = vmatpush1.bf16.msra.mxu0 %v2876_v5  ;;  %v2947_v5 = vld [vmem:[#allocation8 + $0x5b4] ss:$24 sps:$4 sm:$0xff]  }
 0x1c8   :  { %1808 = vmatprep.subr.bf16.mxu0 %v2881_v6  ;;  %v2945_v6 = vld [vmem:[#allocation8 + $0x5b0] ss:$24 sps:$4 sm:$0xff]  }
 0x1cb   :  { %1809 = vmatpush1.bf16.msra.mxu0 %v2879_v7  ;;  %v2950_v7 = vld [vmem:[#allocation8 + $0x5e4] ss:$24 sps:$4 sm:$0xff]  }
 0x1cc   :  { %1810 = vmatprep.subr.bf16.mxu0 %v2884_v8  ;;  %v2948_v8 = vld [vmem:[#allocation8 + $0x5e0] ss:$24 sps:$4 sm:$0xff]  }
 0x1cf   :  { %1811 = vmatpush1.bf16.msra.mxu0 %v2882_v9  ;;  %v636_v9 = vld [vmem:[%s3402_s4] sm:$0x3f] }
 0x1d0   :  { %1812 = vmatprep.subr.bf16.mxu0 %v2887_v10  ;;  %v641_v10 = vrot.slane %v636_v9, %v134_v43 }
 0x1d3   :  { %1813 = vmatpush1.bf16.msra.mxu0 %v2885_v11  ;;  %v653_v11 = vrot.slane %v636_v9, %v146_v58  ;;  %v2965_v58 = vld [vmem:[#allocation10 + $0x78] sm:$0xff]  }
 0x1d4   :  { %1814 = vmatprep.subr.bf16.mxu0 %v2890_v12  ;;  %v2962_v12 = vld [vmem:[#allocation10 + $0x28] sm:$0xff]  }
 0x1d5   :  { %2560 = vmatpush3.bf16.msra.mxu1 %v2962_v12 }
 0x1d7   :  { %1815 = vmatpush1.bf16.msra.mxu0 %v2888_v13 }
 0x1d8   :  { %1816 = vmatprep.subr.bf16.mxu0 %v2893_v14 }
 0x1db   :  { %1817 = vmatpush1.bf16.msra.mxu0 %v2891_v15 }
 0x1dc   :  { %1818 = vmatprep.subr.bf16.mxu0 %v2896_v16 }
 0x1df   :  { %1819 = vmatpush1.bf16.msra.mxu0 %v2894_v17 }
 0x1e0   :  { %1820 = vmatprep.subr.bf16.mxu0 %v2899_v18  ;;  %v2963_v18 = vld [vmem:[#allocation10 + $0x70] sm:$0xff]  }
 0x1e1   :  { %2561 = vmatprep.subr.bf16.mxu1 %v2963_v18 }
 0x1e3   :  { %1821 = vmatpush1.bf16.msra.mxu0 %v2897_v19 }
 0x1e4   :  { %1822 = vmatprep.subr.bf16.mxu0 %v2902_v20 }
 0x1e7   :  { %1823 = vmatpush1.bf16.msra.mxu0 %v2900_v21  ;;  %v2964_v21 = vld [vmem:[#allocation10 + $0x30] sm:$0xff]  }
 0x1e8   :  { %1833 = vmatprep.subr.bf16.mxu0 %v2905_v22  ;;  %2562 = vmatpush3.bf16.msra.mxu1 %v2964_v21 }
 0x1e9   :  { %2563 = vmatprep.subr.bf16.mxu1 %v2965_v58 }
 0x1ea   :  { %1825 = vmatmul.mubr.bf16.vlgmr.msra.gmra.mrb[4].mxu0 %v3323_v32  ;;  %v2918_v32 = vld [vmem:[#allocation8 + $0x400] ss:$24 sps:$4 sm:$0xff]  }
 0x1eb   :  { %1834 = vmatpush1.bf16.msra.mxu0 %v2903_v23  ;;  %1865 = vmatprep.mubr.bf16.mxu0 %v3331_v51  ;;  %v2921_v51 = vld [vmem:[#allocation8 + $0x430] ss:$24 sps:$4 sm:$0xff]  }
 0x1ec   :  { %1835 = vmatprep.subr.bf16.mxu0 %v2908_v24 }
 0x1ef   :  { %1836 = vmatpush1.bf16.msra.mxu0 %v2906_v25 }
 0x1f0   :  { %1837 = vmatprep.subr.bf16.mxu0 %v2911_v26 }
 0x1f3   :  { %1838 = vmatpush1.bf16.msra.mxu0 %v2909_v27  ;;  %v2966_v27 = vld [vmem:[#allocation10 + $0x38] sm:$0xff]  }
 0x1f4   :  { %1839 = vmatprep.subr.bf16.mxu0 %v2914_v29  ;;  %2564 = vmatpush3.bf16.msra.mxu1 %v2966_v27 }
 0x1f7   :  { %1840 = vmatpush1.bf16.msra.mxu0 %v2912_v30  ;;  %v3160_v30 = vmov 0.0  }
 0x1f8   :  { %1841 = vmatprep.subr.bf16.mxu0 %v2917_v31  ;;  %2589 = vmatprep.subr.bf16.mxu1 %v3160_v30  ;;  %v645_v31 = vrot.slane %v636_v9, %v138_v45 }
 0x1fb   :  { %1842 = vmatpush1.bf16.msra.mxu0 %v2915_v33  ;;  %v649_v33 = vrot.slane %v636_v9, %v142_v55 }
 0x1fc   :  { %1843 = vmatprep.subr.bf16.mxu0 %v2920_v34 }
 0x1ff   :  { %1844 = vmatpush1.bf16.msra.mxu0 %v2918_v32  ;;  %v657_v32 = vrot.slane %v636_v9, %v150_v49 }
 0x200   :  { %1845 = vmatprep.subr.bf16.mxu0 %v2923_v35 }
 0x203   :  { %1846 = vmatpush1.bf16.msra.mxu0 %v2921_v51  ;;  %v661_v51 = vrot.slane %v636_v9, %v154_v52  ;;  %v2968_v52 = vld [vmem:[#allocation10 + $0x88] sm:$0xff]   ;;  %v2982_v9 = vld [vmem:[#allocation11 + $0x38] sm:$0xff]  }
 0x204   :  { %1847 = vmatprep.subr.bf16.mxu0 %v2926_v36 }
 0x207   :  { %1848 = vmatpush1.bf16.msra.mxu0 %v2924_v37 }
 0x208   :  { %1849 = vmatprep.subr.bf16.mxu0 %v2929_v38 }
 0x20b   :  { %1850 = vmatpush1.bf16.msra.mxu0 %v2927_v40 }
 0x20c   :  { %1851 = vmatprep.subr.bf16.mxu0 %v2932_v47 }
 0x20f   :  { %1852 = vmatpush1.bf16.msra.mxu0 %v2930_v50 }
 0x210   :  { %1853 = vmatprep.subr.bf16.mxu0 %v2935_v54 }
 0x213   :  { %1854 = vmatpush1.bf16.msra.mxu0 %v2933_v59 }
 0x214   :  { %1855 = vmatprep.subr.bf16.mxu0 %v2938_v61  ;;  %v2969_v61 = vld [vmem:[#allocation10 + $0x90] sm:$0xff]  }
 0x217   :  { %1856 = vmatpush1.bf16.msra.mxu0 %v2936_v63  ;;  %v2971_v63 = vld [vmem:[#allocation10 + $0xa0] sm:$0xff]  }
 0x218   :  { %1857 = vmatprep.subr.bf16.mxu0 %v2941_v0  ;;  %v2973_v0 = vld [vmem:[#allocation10 + $0xb0] sm:$0xff]  }
 0x21b   :  { %1858 = vmatpush1.bf16.msra.mxu0 %v2939_v2 }
 0x21c   :  { %1859 = vmatprep.subr.bf16.mxu0 %v2944_v28  ;;  %v2976_v28 = vld [vmem:[#allocation11 + $0x8] sm:$0xff]  }
 0x21f   :  { %1860 = vmatpush1.bf16.msra.mxu0 %v2942_v4  ;;  %v2977_v4 = vld [vmem:[#allocation11 + $0x10] sm:$0xff]  }
 0x220   :  { %1861 = vmatprep.subr.bf16.mxu0 %v2947_v5  ;;  %v2978_v5 = vld [vmem:[#allocation11 + $0x18] sm:$0xff]  }
 0x223   :  { %1862 = vmatpush1.bf16.msra.mxu0 %v2945_v6  ;;  %v2979_v6 = vld [vmem:[#allocation11 + $0x20] sm:$0xff]  }
 0x224   :  { %1863 = vmatprep.subr.bf16.mxu0 %v2950_v7  ;;  %v2980_v7 = vld [vmem:[#allocation11 + $0x28] sm:$0xff]  }
 0x227   :  { %1864 = vmatpush1.bf16.msra.mxu0 %v2948_v8  ;;  %v2981_v8 = vld [vmem:[#allocation11 + $0x30] sm:$0xff]  }
 0x22a   :  { %1866 = vmatmul.mubr.bf16.vlgmr.msra.gmra.mrb[4].mxu0 %v3337_v56 }
 0x27d   :  { %v1703_v13 = vpop.f32.mrb[0].mxu0  ;;  %v1785_v14 = vpop.f32.mrb[16].mxu1 }
 0x27e   :  { %v2629_v15 = vadd.f32 %v1703_v13, %v641_v10  ;;  %v1705_v16 = vpop.f32.mrb[1].mxu0  ;;  %v1787_v17 = vpop.f32.mrb[17].mxu1  ;;  %v2631_v35 = vadd.f32 %v1785_v14, %v649_v33 }
 0x27f   :  { %v2632_v19 = vadd.f32 %v1787_v17, %v653_v11  ;;  %v1707_v56 = vpop.f32.mrb[2].mxu0  ;;  %v1789_v20 = vpop.f32.mrb[18].mxu1  ;;  %v2630_v34 = vadd.f32 %v1705_v16, %v645_v31 }
 0x280   :  { %v1874_v22 = vmul.f32 0.01, %v2629_v15  ;;  %v1708_v23 = vpop.f32.mrb[3].mxu0  ;;  %v1790_v24 = vpop.f32.mrb[19].mxu1  ;;  %v1876_v41 = vmul.f32 0.01, %v2631_v35 }
 0x281   :  { %v1877_v43 = vmul.f32 0.01, %v2632_v19  ;;  %v1875_v37 = vmul.f32 0.01, %v2630_v34  ;;  %v2540_v23 = vld [vmem:[%s3406_s8] ss:$0 sm:$0xff] }
 0x282   :  { %v1880_v25 = vmax.f32 %v2629_v15, %v1874_v22  ;;  %v1882_v53 = vmax.f32 %v2631_v35, %v1876_v41  ;;  %v2515_v15 = vld [vmem:[%s3404_s6] ss:$0 sm:$0xff]  ;;  %s3115_s6 = scalar_lea.vmem %s2292_s21, 128 }
 0x283   :  { %v1883_v26 = vmax.f32 %v2632_v19, %v1877_v43  ;;  %v1881_v50 = vmax.f32 %v2630_v34, %v1875_v37  ;;  %p3116_p6 = scmp.ne.s32.totalorder %s2292_s21, %s3115_s6  ;;  %p3121_p8 = scmp.lt.s32.totalorder %s3115_s6, %s3115_s6 }
 0x285   :  { %v1886_v29 = vmax.f32 %v1880_v25, %v1883_v26  ;;  %p3122_p9 = por %p3121_p8, %p3120_p7 }
 0x287   :  { %v1889_v39 = vpack.c.bf16 %v1886_v29, %v1886_v29  ;;  %p3123_p10 = pnand %p3122_p9, %p3116_p6 }
 0x2fd   :  { %v1867_v36 = vpop.f32.mrb[4].mxu0 }
 0x2fe   :  { %v2633_v38 = vadd.f32 %v1867_v36, %v657_v32  ;;  %v1869_v40 = vpop.f32.mrb[5].mxu0 }
 0x2ff   :  { %v2634_v42 = vadd.f32 %v1869_v40, %v661_v51  ;;  %v1871_v46 = vpop.f32.mrb[6].mxu0 }
 0x300   :  { %v1878_v47 = vmul.f32 0.01, %v2633_v38  ;;  %v1872_v45 = vpop.f32.mrb[7].mxu0 }
 0x301   :  { %v1879_v48 = vmul.f32 0.01, %v2634_v42 }
 0x302   :  { %v1884_v55 = vmax.f32 %v2633_v38, %v1878_v47 }
 0x303   :  { %v1885_v54 = vmax.f32 %v2634_v42, %v1879_v48 }
 0x304   :  { %v1887_v57 = vmax.f32 %v1881_v50, %v1884_v55 }
 0x305   :  { %v1888_v49 = vmax.f32 %v1882_v53, %v1885_v54 }
 0x306   :  { %v1890_v59 = vpack.c.bf16 %v1887_v57, %v1887_v57 }
 0x307   :  { %v1891_v2 = vpack.c.bf16 %v1888_v49, %v1888_v49 }
 0x308   :  { %2123 = vmatprep.mubr.bf16.mxu1 %v1890_v59 }
 0x309   :  { %2124 = vmatmul.mubr.bf16.vlgmr.msra.gmra.mrb[20].mxu1 %v1889_v39 }
 0x30a   :  { %2590 = vmatpush3.bf16.msra.mxu1 %v2967_v60  ;;  %2605 = vmatprep.mubr.msk.bf16.mxu1 %vm3161_vm1, %v3160_v30 }
 0x30b   :  { %2591 = vmatprep.subr.bf16.mxu1 %v3160_v30 }
 0x30e   :  { %2592 = vmatpush3.bf16.msra.mxu1 %v2968_v52 }
 0x30f   :  { %2593 = vmatprep.subr.bf16.mxu1 %v3160_v30 }
 0x312   :  { %2594 = vmatpush3.bf16.msra.mxu1 %v2969_v61 }
 0x313   :  { %2595 = vmatprep.subr.bf16.mxu1 %v3160_v30 }
 0x316   :  { %2596 = vmatpush3.bf16.msra.mxu1 %v2970_v62 }
 0x317   :  { %2597 = vmatprep.subr.bf16.mxu1 %v3160_v30 }
 0x31a   :  { %2598 = vmatpush3.bf16.msra.mxu1 %v2971_v63 }
 0x31b   :  { %2599 = vmatprep.subr.bf16.mxu1 %v3160_v30 }
 0x31e   :  { %2600 = vmatpush3.bf16.msra.mxu1 %v2972_v44 }
 0x31f   :  { %2601 = vmatprep.subr.bf16.mxu1 %v3160_v30 }
 0x322   :  { %2602 = vmatpush3.bf16.msra.mxu1 %v2973_v0 }
 0x323   :  { %2603 = vmatprep.subr.bf16.mxu1 %v3160_v30 }
 0x326   :  { %2604 = vmatpush3.bf16.msra.mxu1 %v2974_v1 }
 0x327   :  { %2609 = vmatprep.subr.bf16.mxu1 %v3160_v30 }
 0x329   :  { %2606 = vmatmul.mubr.bf16.vlgmr.msra.gmra.mrb[24].mxu1 %v1891_v2 }
 0x32a   :  { %2625 = vmatprep.mubr.msk.bf16.mxu1 %vm3161_vm1, %v3160_v30  ;;  %2610 = vmatpush3.bf16.msra.mxu1 %v2975_v3 }
 0x32b   :  { %2611 = vmatprep.subr.bf16.mxu1 %v3160_v30 }
 0x32e   :  { %2612 = vmatpush3.bf16.msra.mxu1 %v2976_v28 }
 0x32f   :  { %2613 = vmatprep.subr.bf16.mxu1 %v3160_v30 }
 0x332   :  { %2614 = vmatpush3.bf16.msra.mxu1 %v2977_v4 }
 0x333   :  { %2615 = vmatprep.subr.bf16.mxu1 %v3160_v30 }
 0x336   :  { %2616 = vmatpush3.bf16.msra.mxu1 %v2978_v5 }
 0x337   :  { %2617 = vmatprep.subr.bf16.mxu1 %v3160_v30 }
 0x33a   :  { %2618 = vmatpush3.bf16.msra.mxu1 %v2979_v6 }
 0x33b   :  { %2619 = vmatprep.subr.bf16.mxu1 %v3160_v30 }
 0x33e   :  { %2620 = vmatpush3.bf16.msra.mxu1 %v2980_v7 }
 0x33f   :  { %2621 = vmatprep.subr.bf16.mxu1 %v3160_v30 }
 0x342   :  { %2622 = vmatpush3.bf16.msra.mxu1 %v2981_v8 }
 0x343   :  { %2623 = vmatprep.subr.bf16.mxu1 %v3160_v30 }
 0x346   :  { %2624 = vmatpush3.bf16.msra.mxu1 %v2982_v9 }
 0x3dc   :  { %v2565_v10 = vpop.f32.mrb[20].mxu1 }
 0x3dd   :  { %v2566_v11 = vpop.f32.mrb[21].mxu1 }
 0x3de   :  { %v2567_v12 = vadd.f32 %v2566_v11, %v2565_v10  ;;  %v2568_v13 = vpop.f32.mrb[22].mxu1 }
 0x3df   :  { %v2569_v14 = vpop.f32.mrb[23].mxu1 }
 0x3e0   :  { %v2126_v16 = vadd.f32 %v2567_v12, %v2515_v15 }
 0x3fc   :  { %v2165_v17 = vpop.f32.mrb[24].mxu1 }
 0x3fd   :  { %v2166_v18 = vadd.f32 %v2165_v17, %v2126_v16  ;;  %v2607_v19 = vpop.f32.mrb[25].mxu1 }
 0x3fe   :  { %v2168_v56 = vpop.f32.mrb[26].mxu1 }
 0x3ff   :  { %v2171_v20 = vmax.f32 %v2166_v18, 0.0  ;;  %v2608_v21 = vpop.f32.mrb[27].mxu1 }
 0x401   :  { %v2172_v22 = vpack.c.bf16 %v2171_v20, %v2171_v20 }
 0x403   :  { %2626 = vmatmul.mubr.bf16.vlgmr.msra.gmra.mrb[28].mxu1 %v2172_v22 }
 0x4d6   :  { %v2278_v24 = vpop.f32.mrb[28].mxu1 }
 0x4d7   :  { %v2279_v43 = vadd.f32 %v2540_v23, %v2278_v24  ;;  %v2627_v25 = vpop.f32.mrb[29].mxu1 }
 0x4d8   :  { %v2281_v58 = vpop.f32.mrb[30].mxu1 }
 0x4d9   :  { %2284 = vst [vmem:[#allocation13] sm:$0xff] %v2279_v43  ;;  %v2628_v26 = vpop.f32.mrb[31].mxu1 }
 0x4da   :  { %3126 = shalt.err (!%p3123_p10)
}
 0x4db   :  { %s3127_s8 = scalar_lea.hbm %s3407_s9, 128 }
 0x4dc   :  { %p3128_p11 = scmp.ne.s32.totalorder %s3407_s9, %s3127_s8  ;;  %p3131_p12 = scmp.lt.u32.totalorder %s3127_s8, %s3407_s9 }
 0x4de   :  { %p3133_p13 = pnand %p3131_p12, %p3128_p11 }
 0x4e0   :  { %3136 = shalt.err (!%p3133_p13)
}
 0x4e1   :  { %2294 = dma.vmem_to_hbm [thread:$0]  %s2292_s21, 128, %s3407_s9, [#allocation4]  }
 0x4e2   :  { %3145 = dma.done.wait [#allocation4], 128  }
 0x4e3   :  { %3146 = vsyncadd [#allocation4], 4294967168 }
 0x4e4   :  { %2298 = vsyncpa [#allocation3], 1 }
 0x4e5   :  { %2299 = vsyncpa [#allocation6], 1 }
 0x4e6   :  { %2300 = vsyncpa [#allocation9], 1 }
 0x4e7   :  { %2301 = vsyncpa [#allocation12], 1 }
 0x4e8   :  { %2302 = vsyncpa [#allocation4], 1 }

</bundles_post_ra>
